<compile_context>
chip_gen: v6e
topology: v6e:2x2x1
jax: 0.10.0
libtpu: 0.0.40
codegen_flags: <defaults>
</compile_context>

<pallas_src>
import math
import functools

import jax
import jax.numpy as jnp
from jax.experimental import pallas as pl
from jax.experimental.pallas import tpu as pltpu

# ----------------------------- config (small, synthetic) ---------------------
NUM_LAYERS = 2            # real module hard-codes 32; kept small + parameterized
BATCH = 1
SEQ = 8                   # chunk_size: hidden == beacon == forget == memory seq
HIDDEN = 128              # lane-dense (multiple of 128)
NUM_HEADS = 2
HEAD_DIM = HIDDEN // NUM_HEADS
HHD = NUM_HEADS * HEAD_DIM
INTERMEDIATE = 256        # lane-dense
VOCAB = 128
GAIN = 1.0
USE_NORM = True
RMS_EPS = 1e-5
DTYPE = jnp.bfloat16      # bf16 containers -> bf16 MXU path, f32 accumulation
VMEM_LIMIT = 64 * 1024 * 1024


# ============================= Pallas kernels =================================
# --- 1) fused input-RMSNorm + per-stream Q / K|V projections ------------------
# grid=(4,): 0=hidden, 1=beacon, 2=forget, 3=memory (ProjectHead, no layernorm).
def _norm_qkv_kernel(eps, x_ref, lnw_ref, wq_ref, wkv_ref, q_out_ref, kv_out_ref):
    s = pl.program_id(0)
    x = x_ref[0].astype(jnp.float32)                          # [T, D]
    var = jnp.mean(x * x, axis=-1, keepdims=True)
    normed = x * jax.lax.rsqrt(var + eps) * lnw_ref[...].astype(jnp.float32)
    # streams 0..2 are input_layernorm'ed; stream 3 (memory) feeds ProjectHead raw.
    xin = jnp.where(s < 3, normed, x).astype(x_ref.dtype)     # bf16 into the MXU
    kv_out_ref[0] = jnp.dot(xin, wkv_ref[0],
                            preferred_element_type=jnp.float32).astype(kv_out_ref.dtype)
    # stream 3 reuses the forget q weight (already resident, no extra DMA); its
    # q output block is junk and never read downstream.
    # TODO(synk): skip this matmul at s==3 with pl.when at real scale.
    q_out_ref[0] = jnp.dot(xin, wq_ref[0],
                           preferred_element_type=jnp.float32).astype(q_out_ref.dtype)


def fused_norm_qkv(x4, ln_w, w_q, w_kv):
    """x4: [4, B*S, D]; w_q: [3, D, HHD]; w_kv: [4, D, 2*HHD]."""
    NS, T, D = x4.shape
    HHD_ = w_q.shape[-1]
    return pl.pallas_call(
        functools.partial(_norm_qkv_kernel, RMS_EPS),
        out_shape=(jax.ShapeDtypeStruct((NS, T, HHD_), x4.dtype),
                   jax.ShapeDtypeStruct((NS, T, 2 * HHD_), x4.dtype)),
        grid=(NS,),
        in_specs=[
            pl.BlockSpec((1, T, D), lambda i: (i, 0, 0)),
            pl.BlockSpec((1, D), lambda i: (0, 0)),
            pl.BlockSpec((1, D, HHD_), lambda i: (jnp.minimum(i, 2), 0, 0)),
            pl.BlockSpec((1, D, 2 * HHD_), lambda i: (i, 0, 0)),
        ],
        out_specs=(pl.BlockSpec((1, T, HHD_), lambda i: (i, 0, 0)),
                   pl.BlockSpec((1, T, 2 * HHD_), lambda i: (i, 0, 0))),
        compiler_params=pltpu.CompilerParams(
            dimension_semantics=("parallel",),
            vmem_limit_bytes=VMEM_LIMIT),
    )(x4, ln_w.reshape(1, D), w_q, w_kv)


# --- 2) fused RoPE + causal mask + softmax attention (heads merged in-kernel) --
def _attention_kernel(scale, S, H, hd, q_ref, kvm_ref, kvh_ref, kvt_ref,
                      cq_ref, sq_ref, ck_ref, sk_ref, o_ref):
    sidx = pl.program_id(0)                                   # 0=hidden,1=beacon,2=forget
    HHD_ = H * hd
    Sk = 3 * S
    q = q_ref[0]                                              # [S, HHD] bf16
    # keys/values = [memory | hidden | per-stream tail]; hidden's tail is masked.
    k_all = jnp.concatenate([kvm_ref[0, :, :HHD_],
                             kvh_ref[0, :, :HHD_],
                             kvt_ref[0, :, :HHD_]], axis=0)   # [3S, HHD]
    v_all = jnp.concatenate([kvm_ref[0, :, HHD_:],
                             kvh_ref[0, :, HHD_:],
                             kvt_ref[0, :, HHD_:]], axis=0)

    # absolute positions: memory [0,S), hidden [S,2S), beacon/forget [2S,3S)
    q_start = S * (1 + jnp.minimum(sidx, 1))
    row = jax.lax.broadcasted_iota(jnp.int32, (S, Sk), 0) + q_start
    col = jax.lax.broadcasted_iota(jnp.int32, (S, Sk), 1)
    visible = col <= row
    # explicit: the hidden stream has no tail keys (don't rely on positions alone)
    visible = jnp.logical_and(visible, jnp.logical_or(col < 2 * S, sidx >= 1))

    cq = cq_ref[0]                                            # [S, hd] f32
    sq = sq_ref[0]
    ck = ck_ref[...]                                          # [3S, hd] f32
    sk = sk_ref[...]

    def rope(x, c, sn):                                       # rotate_half, f32 math
        xf = x.astype(jnp.float32)
        x1 = xf[:, : hd // 2]
        x2 = xf[:, hd // 2:]
        return xf * c + jnp.concatenate([-x2, x1], axis=-1) * sn

    heads = []
    for h in range(H):                                        # static unroll, small H
        sl = slice(h * hd, (h + 1) * hd)
        qh = rope(q[:, sl], cq, sq).astype(q.dtype)           # bf16 into the MXU
        kh = rope(k_all[:, sl], ck, sk).astype(q.dtype)
        vh = v_all[:, sl]
        sc = jnp.einsum("qd,kd->qk", qh, kh,
                        preferred_element_type=jnp.float32) * scale
        sc = jnp.where(visible, sc, -1e30)
        sc = sc - jnp.max(sc, axis=-1, keepdims=True)
        p = jnp.exp(sc)
        p = p * pl.reciprocal(jnp.sum(p, axis=-1, keepdims=True), approx=True)
        heads.append(jnp.einsum("qk,kd->qd", p.astype(vh.dtype), vh,
                                preferred_element_type=jnp.float32))
    # heads merged in-kernel -> lane-dense [S, H*hd] output block
    o_ref[0] = jnp.concatenate(heads, axis=-1).astype(o_ref.dtype)


def fused_attention(q_out, kv_out, cos3, sin3, cos_k, sin_k, B, S):
    """q_out: [4, B*S, HHD]; kv_out: [4, B*S, 2*HHD]; cos3/sin3: [3, S, hd];
    cos_k/sin_k: [3S, hd]  ->  [3, B*S, HHD]."""
    HHD_ = q_out.shape[-1]
    hd = cos3.shape[-1]
    H = HHD_ // hd
    scale = 1.0 / math.sqrt(hd)
    T = B * S
    return pl.pallas_call(
        functools.partial(_attention_kernel, scale, S, H, hd),
        out_shape=jax.ShapeDtypeStruct((3, T, HHD_), q_out.dtype),
        grid=(3, B),
        in_specs=[
            pl.BlockSpec((1, S, HHD_), lambda i, b: (i, b, 0)),           # per-stream q
            pl.BlockSpec((1, S, 2 * HHD_), lambda i, b: (3, b, 0)),       # memory  K|V (shared)
            pl.BlockSpec((1, S, 2 * HHD_), lambda i, b: (0, b, 0)),       # hidden  K|V (shared)
            pl.BlockSpec((1, S, 2 * HHD_), lambda i, b: (i, b, 0)),       # tail    K|V (per stream)
            pl.BlockSpec((1, S, hd), lambda i, b: (1 + jnp.minimum(i, 1), 0, 0)),  # cos_q
            pl.BlockSpec((1, S, hd), lambda i, b: (1 + jnp.minimum(i, 1), 0, 0)),  # sin_q
            pl.BlockSpec((3 * S, hd), lambda i, b: (0, 0)),               # cos (all key pos)
            pl.BlockSpec((3 * S, hd), lambda i, b: (0, 0)),               # sin (all key pos)
        ],
        out_specs=pl.BlockSpec((1, S, HHD_), lambda i, b: (i, b, 0)),
        compiler_params=pltpu.CompilerParams(
            dimension_semantics=("parallel", "parallel"),
            vmem_limit_bytes=VMEM_LIMIT),
    )(q_out, kv_out, kv_out, kv_out, cos3, sin3, cos_k, sin_k)


# --- 3) fused o_proj + residual + post-RMSNorm + SwiGLU MLP + residual --------
def _oproj_mlp_kernel(eps, a_ref, r_ref, wo_ref, lnw_ref, wg_ref, wu_ref, wd_ref, o_ref):
    a = a_ref[0]                                              # [T, HHD] bf16
    h1 = r_ref[0].astype(jnp.float32) + jnp.dot(
        a, wo_ref[...], preferred_element_type=jnp.float32)   # f32 residual
    var = jnp.mean(h1 * h1, axis=-1, keepdims=True)
    normed = (h1 * jax.lax.rsqrt(var + eps)
              * lnw_ref[...].astype(jnp.float32)).astype(a.dtype)   # bf16 into MXU
    g = jnp.dot(normed, wg_ref[...], preferred_element_type=jnp.float32)
    u = jnp.dot(normed, wu_ref[...], preferred_element_type=jnp.float32)
    act = ((g * jax.nn.sigmoid(g)) * u).astype(a.dtype)       # SiLU(gate)*up, bf16 into MXU
    mlp = jnp.dot(act, wd_ref[...], preferred_element_type=jnp.float32)
    o_ref[0] = (h1 + mlp).astype(o_ref.dtype)


def fused_oproj_mlp(attn, res, wo, post_ln, wg, wu, wd):
    """attn: [3, B*S, HHD]; res: [3, B*S, D] -> [3, B*S, D]."""
    NS, T, HHD_ = attn.shape
    D = res.shape[-1]
    I = wg.shape[-1]
    return pl.pallas_call(
        functools.partial(_oproj_mlp_kernel, RMS_EPS),
        out_shape=jax.ShapeDtypeStruct((NS, T, D), res.dtype),
        grid=(NS,),
        in_specs=[
            pl.BlockSpec((1, T, HHD_), lambda i: (i, 0, 0)),
            pl.BlockSpec((1, T, D), lambda i: (i, 0, 0)),
            pl.BlockSpec((HHD_, D), lambda i: (0, 0)),
            pl.BlockSpec((1, D), lambda i: (0, 0)),
            pl.BlockSpec((D, I), lambda i: (0, 0)),
            pl.BlockSpec((D, I), lambda i: (0, 0)),
            pl.BlockSpec((I, D), lambda i: (0, 0)),
        ],
        out_specs=pl.BlockSpec((1, T, D), lambda i: (i, 0, 0)),
        compiler_params=pltpu.CompilerParams(
            dimension_semantics=("parallel",),
            vmem_limit_bytes=VMEM_LIMIT),
    )(attn, res, wo, post_ln.reshape(1, D), wg, wu, wd)


# --- 4) fused memory gate + MemoryNorm (single step, aliased output) ----------
def _memgate_norm_kernel(gain, eps, use_norm, m_ref, i_ref, f_ref, w_ref, o_ref):
    f = f_ref[...].astype(jnp.float32) * gain
    g = jax.nn.sigmoid(f)
    out = m_ref[...].astype(jnp.float32) * g + i_ref[...].astype(jnp.float32) * (1.0 - g)
    if use_norm:
        var = jnp.mean(out * out, axis=-1, keepdims=True)
        out = (out * jax.lax.rsqrt(var + eps)).astype(o_ref.dtype) * w_ref[...]
    o_ref[...] = out.astype(o_ref.dtype)


def fused_memgate_norm(memory, inject, forget, w, gain, use_norm):
    """memory/inject/forget: [L*B, S, D] -> gated (+ normalized) memory."""
    LB, S, D = memory.shape
    m2 = memory.reshape(LB * S, D)
    i2 = inject.reshape(LB * S, D)
    f2 = forget.reshape(LB * S, D)
    out = pl.pallas_call(
        functools.partial(_memgate_norm_kernel, gain, RMS_EPS, use_norm),
        out_shape=jax.ShapeDtypeStruct((LB * S, D), memory.dtype),
        input_output_aliases={0: 0},      # gated memory reuses the memory buffer
        compiler_params=pltpu.CompilerParams(vmem_limit_bytes=VMEM_LIMIT),
    )(m2, i2, f2, w.reshape(1, D))
    return out.reshape(LB, S, D)


# ============================= plain-JAX glue =================================
def rope_tables(n_pos, hd, base=10000.0):
    inv_freq = 1.0 / (base ** (jnp.arange(0, hd, 2, dtype=jnp.float32) / hd))
    t = jnp.arange(n_pos, dtype=jnp.float32)
    freqs = jnp.outer(t, inv_freq)
    emb = jnp.concatenate([freqs, freqs], axis=-1)
    return jnp.cos(emb), jnp.sin(emb)                         # [n_pos, hd] f32


def layer_forward(p, hidden, memory_states, beacon, forget, cos3, sin3, cos_k, sin_k):
    B, S, D = hidden.shape
    assert memory_states.shape[1] == S
    # residual = raw concat([hidden, beacon, forget], seq), kept per-stream.
    res = jnp.stack([hidden, beacon, forget], axis=0).reshape(3, B * S, D)
    x4 = jnp.concatenate([res, memory_states.reshape(1, B * S, D)], axis=0)

    q_out, kv_out = fused_norm_qkv(x4, p["input_ln"], p["w_q"], p["w_kv"])
    attn = fused_attention(q_out, kv_out, cos3, sin3, cos_k, sin_k, B, S)
    out = fused_oproj_mlp(attn, res, p["o"], p["post_ln"],
                          p["mlp_gate"], p["mlp_up"], p["mlp_down"])
    out = out.reshape(3, B, S, D)
    return out[0], out[1], out[2]


def encoder_forward(params, input_ids, memory, beacon, forget):
    B, S = input_ids.shape
    # only the positions actually used: memory(S) + hidden(S) + beacon/forget(S)
    cos_k, sin_k = rope_tables(3 * S, HEAD_DIM)
    cos3 = cos_k.reshape(3, S, HEAD_DIM)
    sin3 = sin_k.reshape(3, S, HEAD_DIM)

    hidden = jnp.take(params["embed"], input_ids, axis=0)     # embed_tokens
    bcn, fgt = beacon, forget
    rec_b, rec_f = [], []
    for layer_p, mem_states in zip(params["layers"],
                                   jnp.split(memory, NUM_LAYERS, axis=0)):
        rec_b.append(bcn)                  # recorded *before* each layer (matches torch)
        rec_f.append(fgt)
        hidden, bcn, fgt = layer_forward(layer_p, hidden, mem_states, bcn, fgt,
                                         cos3, sin3, cos_k, sin_k)
    inject = jnp.concatenate(rec_b, axis=0)
    forget_cat = jnp.concatenate(rec_f, axis=0)
    return fused_memgate_norm(memory, inject, forget_cat, params["mem_norm"],
                              GAIN, USE_NORM)


# ----------------------------- params -----------------------------------------
def init_params(key):
    def nrm(k, shape, scale=0.02):
        return (scale * jax.random.normal(k, shape)).astype(DTYPE)

    keys = jax.random.split(key, 2 + NUM_LAYERS)
    params = {
        "embed": nrm(keys[0], (VOCAB, HIDDEN)),
        "mem_norm": jnp.ones((HIDDEN,), DTYPE),
        "layers": [],
    }
    D, I = HIDDEN, INTERMEDIATE
    for li in range(NUM_LAYERS):
        lk = jax.random.split(keys[2 + li], 16)
        q = nrm(lk[0], (D, HHD)); k_ = nrm(lk[1], (D, HHD)); v = nrm(lk[2], (D, HHD))
        o = nrm(lk[3], (HHD, D))
        phk = nrm(lk[4], (D, HHD)); phv = nrm(lk[5], (D, HHD))
        bq = nrm(lk[6], (D, HHD)); bk = nrm(lk[7], (D, HHD)); bv = nrm(lk[8], (D, HHD))
        fq = nrm(lk[9], (D, HHD)); fk = nrm(lk[10], (D, HHD)); fv = nrm(lk[11], (D, HHD))
        # q weights (3 streams only -- the memory stream has no query):
        w_q = jnp.stack([q, bq, fq], axis=0)                          # [3, D, HHD]
        # k|v weights per stream; stream 3 = ProjectHead [ph_key | ph_val]:
        w_kv = jnp.stack([
            jnp.concatenate([k_, v], axis=-1),
            jnp.concatenate([bk, bv], axis=-1),
            jnp.concatenate([fk, fv], axis=-1),
            jnp.concatenate([phk, phv], axis=-1),
        ], axis=0)                                                    # [4, D, 2*HHD]
        params["layers"].append({
            "input_ln": jnp.ones((D,), DTYPE),
            "post_ln": jnp.ones((D,), DTYPE),
            "w_q": w_q,
            "w_kv": w_kv,
            "o": o,
            "mlp_gate": nrm(lk[12], (D, I)),
            "mlp_up": nrm(lk[13], (D, I)),
            "mlp_down": nrm(lk[14], (I, D)),
        })
    return params


# ----------------------------- main --------------------------------------------
if __name__ == "__main__":
    root = jax.random.PRNGKey(0)
    kp, ki, km, kb, kf = jax.random.split(root, 5)
    params = init_params(kp)

    input_ids = jax.random.randint(ki, (BATCH, SEQ), 0, VOCAB)
    memory = jax.random.normal(km, (NUM_LAYERS * BATCH, SEQ, HIDDEN), DTYPE)
    beacon = jax.random.normal(kb, (BATCH, SEQ, HIDDEN), DTYPE)
    forget = jax.random.normal(kf, (BATCH, SEQ, HIDDEN), DTYPE)

    out = jax.jit(encoder_forward)(params, input_ids, memory, beacon, forget)
    out = jax.block_until_ready(out)
    assert out.shape == memory.shape
    assert bool(jnp.all(jnp.isfinite(out.astype(jnp.float32))))
    print("KERNEL_OK")
</pallas_src>

<mosaic_0001>
module attributes {stable_mosaic.version = 11 : i64} {
  func.func @_norm_qkv_kernel(%arg0: i32, %arg1: memref<1x8x128xbf16, #tpu.memory_space<vmem>>, %arg2: memref<1x128xbf16, #tpu.memory_space<vmem>>, %arg3: memref<1x128x128xbf16, #tpu.memory_space<vmem>>, %arg4: memref<1x128x256xbf16, #tpu.memory_space<vmem>>, %arg5: memref<1x8x128xbf16, #tpu.memory_space<vmem>>, %arg6: memref<1x8x256xbf16, #tpu.memory_space<vmem>>) attributes {dimension_semantics = [#tpu.dimension_semantics<parallel>], iteration_bounds = array<i64: 4>, scalar_prefetch = 0 : i64, scratch_operands = 0 : i64, tpu.core_type = #tpu.core_type<tc>, window_params = [{transform_indices = @transform_0, window_bounds = array<i64: 1, 8, 128>}, {pipeline_mode = #tpu.pipeline_mode<synchronous>, transform_indices = @transform_1, window_bounds = array<i64: 1, 128>}, {transform_indices = @transform_2, window_bounds = array<i64: 1, 128, 128>}, {transform_indices = @transform_3, window_bounds = array<i64: 1, 128, 256>}, {transform_indices = @transform_4, window_bounds = array<i64: 1, 8, 128>}, {transform_indices = @transform_5, window_bounds = array<i64: 1, 8, 256>}]} {
    %c0 = arith.constant 0 : index
    %c0_0 = arith.constant 0 : index
    %c0_1 = arith.constant 0 : index
    %0 = vector.load %arg1[%c0, %c0_0, %c0_1] : memref<1x8x128xbf16, #tpu.memory_space<vmem>>, vector<1x8x128xbf16>
    %1 = vector.shape_cast %0 : vector<1x8x128xbf16> to vector<8x128xbf16>
    %2 = arith.extf %1 : vector<8x128xbf16> to vector<8x128xf32>
    %3 = arith.mulf %2, %2 : vector<8x128xf32>
    %cst = arith.constant dense<0.000000e+00> : vector<8xf32>
    %4 = vector.multi_reduction <add>, %3, %cst [1] : vector<8x128xf32> to vector<8xf32>
    %5 = vector.shape_cast %4 : vector<8xf32> to vector<8x1xf32>
    %cst_2 = arith.constant 1.280000e+02 : f32
    %6 = vector.broadcast %cst_2 : f32 to vector<8x1xf32>
    %7 = arith.divf %5, %6 : vector<8x1xf32>
    %cst_3 = arith.constant 9.99999974E-6 : f32
    %8 = vector.broadcast %cst_3 : f32 to vector<8x1xf32>
    %9 = arith.addf %7, %8 : vector<8x1xf32>
    %10 = math.rsqrt %9 : vector<8x1xf32>
    %11 = vector.broadcast %10 : vector<8x1xf32> to vector<8x128xf32>
    %12 = arith.mulf %2, %11 : vector<8x128xf32>
    %c0_4 = arith.constant 0 : index
    %c0_5 = arith.constant 0 : index
    %13 = vector.load %arg2[%c0_4, %c0_5] : memref<1x128xbf16, #tpu.memory_space<vmem>>, vector<1x128xbf16>
    %14 = arith.extf %13 : vector<1x128xbf16> to vector<1x128xf32>
    %15 = vector.broadcast %14 : vector<1x128xf32> to vector<8x128xf32>
    %16 = arith.mulf %12, %15 : vector<8x128xf32>
    %c3_i32 = arith.constant 3 : i32
    %17 = arith.cmpi slt, %arg0, %c3_i32 : i32
    %18 = arith.select %17, %16, %2 : vector<8x128xf32>
    %19 = arith.truncf %18 : vector<8x128xf32> to vector<8x128xbf16>
    %c0_6 = arith.constant 0 : index
    %c0_7 = arith.constant 0 : index
    %c0_8 = arith.constant 0 : index
    %20 = vector.load %arg4[%c0_6, %c0_7, %c0_8] : memref<1x128x256xbf16, #tpu.memory_space<vmem>>, vector<1x128x256xbf16>
    %21 = vector.shape_cast %20 : vector<1x128x256xbf16> to vector<128x256xbf16>
    %cst_9 = arith.constant dense<0.000000e+00> : vector<8x256xf32>
    %22 = tpu.matmul %19, %21, %cst_9 {dimension_numbers = #tpu.dot_dimension_numbers<[1], [0], [0], [1], [0, 0, 1, 1], [], []>} : vector<8x128xbf16>, vector<128x256xbf16>, vector<8x256xf32> -> vector<8x256xf32>
    %23 = arith.truncf %22 : vector<8x256xf32> to vector<8x256xbf16>
    %c0_10 = arith.constant 0 : index
    %c0_11 = arith.constant 0 : index
    %c0_12 = arith.constant 0 : index
    %24 = vector.load %arg6[%c0_10, %c0_11, %c0_12] : memref<1x8x256xbf16, #tpu.memory_space<vmem>>, vector<1x8x256xbf16>
    %25 = vector.shape_cast %24 : vector<1x8x256xbf16> to vector<8x256xbf16>
    %26 = vector.shape_cast %23 : vector<8x256xbf16> to vector<1x8x256xbf16>
    tpu.vector_store %arg6[%c0_10, %c0_11, %c0_12], %26 {strides = array<i32>} : memref<1x8x256xbf16, #tpu.memory_space<vmem>>, vector<1x8x256xbf16>,
    %c0_13 = arith.constant 0 : index
    %c0_14 = arith.constant 0 : index
    %c0_15 = arith.constant 0 : index
    %27 = vector.load %arg3[%c0_13, %c0_14, %c0_15] : memref<1x128x128xbf16, #tpu.memory_space<vmem>>, vector<1x128x128xbf16>
    %28 = vector.shape_cast %27 : vector<1x128x128xbf16> to vector<128x128xbf16>
    %cst_16 = arith.constant dense<0.000000e+00> : vector<8x128xf32>
    %29 = tpu.matmul %19, %28, %cst_16 {dimension_numbers = #tpu.dot_dimension_numbers<[1], [0], [0], [1], [0, 0, 1, 1], [], []>} : vector<8x128xbf16>, vector<128x128xbf16>, vector<8x128xf32> -> vector<8x128xf32>
    %30 = arith.truncf %29 : vector<8x128xf32> to vector<8x128xbf16>
    %c0_17 = arith.constant 0 : index
    %c0_18 = arith.constant 0 : index
    %c0_19 = arith.constant 0 : index
    %31 = vector.load %arg5[%c0_17, %c0_18, %c0_19] : memref<1x8x128xbf16, #tpu.memory_space<vmem>>, vector<1x8x128xbf16>
    %32 = vector.shape_cast %31 : vector<1x8x128xbf16> to vector<8x128xbf16>
    %33 = vector.shape_cast %30 : vector<8x128xbf16> to vector<1x8x128xbf16>
    tpu.vector_store %arg5[%c0_17, %c0_18, %c0_19], %33 {strides = array<i32>} : memref<1x8x128xbf16, #tpu.memory_space<vmem>>, vector<1x8x128xbf16>,
    return
  }
  func.func @transform_0(%arg0: i32) -> (i32, i32, i32) {
    %c0_i32 = arith.constant 0 : i32
    %c0_i32_0 = arith.constant 0 : i32
    %c0_i32_1 = arith.constant 0 : i32
    return %arg0, %c0_i32, %c0_i32_0 : i32, i32, i32
  }
  func.func @transform_1(%arg0: i32) -> (i32, i32) {
    %c0_i32 = arith.constant 0 : i32
    %c0_i32_0 = arith.constant 0 : i32
    %c0_i32_1 = arith.constant 0 : i32
    return %c0_i32, %c0_i32_0 : i32, i32
  }
  func.func @transform_2(%arg0: i32) -> (i32, i32, i32) {
    %c2_i32 = arith.constant 2 : i32
    %0 = arith.minsi %arg0, %c2_i32 : i32
    %c0_i32 = arith.constant 0 : i32
    %c0_i32_0 = arith.constant 0 : i32
    %c0_i32_1 = arith.constant 0 : i32
    return %0, %c0_i32, %c0_i32_0 : i32, i32, i32
  }
  func.func @transform_3(%arg0: i32) -> (i32, i32, i32) {
    %c0_i32 = arith.constant 0 : i32
    %c0_i32_0 = arith.constant 0 : i32
    %c0_i32_1 = arith.constant 0 : i32
    return %arg0, %c0_i32, %c0_i32_0 : i32, i32, i32
  }
  func.func @transform_4(%arg0: i32) -> (i32, i32, i32) {
    %c0_i32 = arith.constant 0 : i32
    %c0_i32_0 = arith.constant 0 : i32
    %c0_i32_1 = arith.constant 0 : i32
    return %arg0, %c0_i32, %c0_i32_0 : i32, i32, i32
  }
  func.func @transform_5(%arg0: i32) -> (i32, i32, i32) {
    %c0_i32 = arith.constant 0 : i32
    %c0_i32_0 = arith.constant 0 : i32
    %c0_i32_1 = arith.constant 0 : i32
    return %arg0, %c0_i32, %c0_i32_0 : i32, i32, i32
  }
}

module attributes {stable_mosaic.version = 11 : i64} {
  func.func @_attention_kernel(%arg0: i32, %arg1: i32, %arg2: memref<1x8x128xbf16, #tpu.memory_space<vmem>>, %arg3: memref<1x8x256xbf16, #tpu.memory_space<vmem>>, %arg4: memref<1x8x256xbf16, #tpu.memory_space<vmem>>, %arg5: memref<1x8x256xbf16, #tpu.memory_space<vmem>>, %arg6: memref<1x8x64xf32, #tpu.memory_space<vmem>>, %arg7: memref<1x8x64xf32, #tpu.memory_space<vmem>>, %arg8: memref<24x64xf32, #tpu.memory_space<vmem>>, %arg9: memref<24x64xf32, #tpu.memory_space<vmem>>, %arg10: memref<1x8x128xbf16, #tpu.memory_space<vmem>>) attributes {dimension_semantics = [#tpu.dimension_semantics<parallel>, #tpu.dimension_semantics<parallel>], iteration_bounds = array<i64: 3, 1>, scalar_prefetch = 0 : i64, scratch_operands = 0 : i64, tpu.core_type = #tpu.core_type<tc>, window_params = [{transform_indices = @transform_0, window_bounds = array<i64: 1, 8, 128>}, {transform_indices = @transform_1, window_bounds = array<i64: 1, 8, 256>}, {transform_indices = @transform_2, window_bounds = array<i64: 1, 8, 256>}, {transform_indices = @transform_3, window_bounds = array<i64: 1, 8, 256>}, {transform_indices = @transform_4, window_bounds = array<i64: 1, 8, 64>}, {transform_indices = @transform_5, window_bounds = array<i64: 1, 8, 64>}, {pipeline_mode = #tpu.pipeline_mode<synchronous>, transform_indices = @transform_6, window_bounds = array<i64: 24, 64>}, {pipeline_mode = #tpu.pipeline_mode<synchronous>, transform_indices = @transform_7, window_bounds = array<i64: 24, 64>}, {transform_indices = @transform_8, window_bounds = array<i64: 1, 8, 128>}]} {
    %c0 = arith.constant 0 : index
    %c0_0 = arith.constant 0 : index
    %c0_1 = arith.constant 0 : index
    %0 = vector.load %arg2[%c0, %c0_0, %c0_1] : memref<1x8x128xbf16, #tpu.memory_space<vmem>>, vector<1x8x128xbf16>
    %1 = vector.shape_cast %0 : vector<1x8x128xbf16> to vector<8x128xbf16>
    %c0_2 = arith.constant 0 : index
    %c0_3 = arith.constant 0 : index
    %c0_4 = arith.constant 0 : index
    %2 = vector.load %arg3[%c0_2, %c0_3, %c0_4] : memref<1x8x256xbf16, #tpu.memory_space<vmem>>, vector<1x8x128xbf16>
    %3 = vector.shape_cast %2 : vector<1x8x128xbf16> to vector<8x128xbf16>
    %c0_5 = arith.constant 0 : index
    %c0_6 = arith.constant 0 : index
    %c0_7 = arith.constant 0 : index
    %4 = vector.load %arg4[%c0_5, %c0_6, %c0_7] : memref<1x8x256xbf16, #tpu.memory_space<vmem>>, vector<1x8x128xbf16>
    %5 = vector.shape_cast %4 : vector<1x8x128xbf16> to vector<8x128xbf16>
    %c0_8 = arith.constant 0 : index
    %c0_9 = arith.constant 0 : index
    %c0_10 = arith.constant 0 : index
    %6 = vector.load %arg5[%c0_8, %c0_9, %c0_10] : memref<1x8x256xbf16, #tpu.memory_space<vmem>>, vector<1x8x128xbf16>
    %7 = vector.shape_cast %6 : vector<1x8x128xbf16> to vector<8x128xbf16>
    %8 = tpu.concatenate %3, %5, %7 in 0 : vector<8x128xbf16>, vector<8x128xbf16>, vector<8x128xbf16> -> vector<24x128xbf16>
    %c0_11 = arith.constant 0 : index
    %c0_12 = arith.constant 0 : index
    %c128 = arith.constant 128 : index
    %9 = vector.load %arg3[%c0_11, %c0_12, %c128] : memref<1x8x256xbf16, #tpu.memory_space<vmem>>, vector<1x8x128xbf16>
    %10 = vector.shape_cast %9 : vector<1x8x128xbf16> to vector<8x128xbf16>
    %c0_13 = arith.constant 0 : index
    %c0_14 = arith.constant 0 : index
    %c128_15 = arith.constant 128 : index
    %11 = vector.load %arg4[%c0_13, %c0_14, %c128_15] : memref<1x8x256xbf16, #tpu.memory_space<vmem>>, vector<1x8x128xbf16>
    %12 = vector.shape_cast %11 : vector<1x8x128xbf16> to vector<8x128xbf16>
    %c0_16 = arith.constant 0 : index
    %c0_17 = arith.constant 0 : index
    %c128_18 = arith.constant 128 : index
    %13 = vector.load %arg5[%c0_16, %c0_17, %c128_18] : memref<1x8x256xbf16, #tpu.memory_space<vmem>>, vector<1x8x128xbf16>
    %14 = vector.shape_cast %13 : vector<1x8x128xbf16> to vector<8x128xbf16>
    %15 = tpu.concatenate %10, %12, %14 in 0 : vector<8x128xbf16>, vector<8x128xbf16>, vector<8x128xbf16> -> vector<24x128xbf16>
    %c1_i32 = arith.constant 1 : i32
    %16 = arith.minsi %arg0, %c1_i32 : i32
    %c1_i32_19 = arith.constant 1 : i32
    %17 = arith.addi %c1_i32_19, %16 : i32
    %c8_i32 = arith.constant 8 : i32
    %18 = arith.muli %c8_i32, %17 : i32
    %19 = tpu.iota {dimensions = array<i32: 0>} : vector<8x24xi32>
    %20 = vector.broadcast %18 : i32 to vector<8x24xi32>
    %21 = arith.addi %19, %20 : vector<8x24xi32>
    %22 = tpu.iota {dimensions = array<i32: 1>} : vector<8x24xi32>
    %23 = arith.cmpi sle, %22, %21 : vector<8x24xi32>
    %c16_i32 = arith.constant 16 : i32
    %24 = vector.broadcast %c16_i32 : i32 to vector<8x24xi32>
    %25 = arith.cmpi slt, %22, %24 : vector<8x24xi32>
    %c1_i32_20 = arith.constant 1 : i32
    %26 = arith.cmpi sge, %arg0, %c1_i32_20 : i32
    %27 = vector.broadcast %26 : i1 to vector<8x24xi1>
    %28 = arith.ori %25, %27 : vector<8x24xi1>
    %29 = arith.andi %23, %28 : vector<8x24xi1>
    %c0_21 = arith.constant 0 : index
    %c0_22 = arith.constant 0 : index
    %c0_23 = arith.constant 0 : index
    %30 = vector.load %arg6[%c0_21, %c0_22, %c0_23] : memref<1x8x64xf32, #tpu.memory_space<vmem>>, vector<1x8x64xf32>
    %31 = vector.shape_cast %30 : vector<1x8x64xf32> to vector<8x64xf32>
    %c0_24 = arith.constant 0 : index
    %c0_25 = arith.constant 0 : index
    %c0_26 = arith.constant 0 : index
    %32 = vector.load %arg7[%c0_24, %c0_25, %c0_26] : memref<1x8x64xf32, #tpu.memory_space<vmem>>, vector<1x8x64xf32>
    %33 = vector.shape_cast %32 : vector<1x8x64xf32> to vector<8x64xf32>
    %c0_27 = arith.constant 0 : index
    %c0_28 = arith.constant 0 : index
    %34 = vector.load %arg8[%c0_27, %c0_28] : memref<24x64xf32, #tpu.memory_space<vmem>>, vector<24x64xf32>
    %c0_29 = arith.constant 0 : index
    %c0_30 = arith.constant 0 : index
    %35 = vector.load %arg9[%c0_29, %c0_30] : memref<24x64xf32, #tpu.memory_space<vmem>>, vector<24x64xf32>
    %36 = vector.extract_strided_slice %1 {offsets = [0, 0], sizes = [8, 64], strides = [1, 1]} : vector<8x128xbf16> to vector<8x64xbf16>
    %37 = arith.extf %36 : vector<8x64xbf16> to vector<8x64xf32>
    %38 = vector.extract_strided_slice %37 {offsets = [0, 0], sizes = [8, 32], strides = [1, 1]} : vector<8x64xf32> to vector<8x32xf32>
    %39 = vector.extract_strided_slice %37 {offsets = [0, 32], sizes = [8, 32], strides = [1, 1]} : vector<8x64xf32> to vector<8x32xf32>
    %40 = arith.mulf %37, %31 : vector<8x64xf32>
    %cst = arith.constant 0.000000e+00 : f32
    %41 = vector.broadcast %cst : f32 to vector<8x32xf32>
    %42 = arith.subf %41, %39 : vector<8x32xf32>
    %43 = tpu.concatenate %42, %38 in 1 : vector<8x32xf32>, vector<8x32xf32> -> vector<8x64xf32>
    %44 = arith.mulf %43, %33 : vector<8x64xf32>
    %45 = arith.addf %40, %44 : vector<8x64xf32>
    %46 = arith.truncf %45 : vector<8x64xf32> to vector<8x64xbf16>
    %47 = vector.extract_strided_slice %8 {offsets = [0, 0], sizes = [24, 64], strides = [1, 1]} : vector<24x128xbf16> to vector<24x64xbf16>
    %48 = arith.extf %47 : vector<24x64xbf16> to vector<24x64xf32>
    %49 = vector.extract_strided_slice %48 {offsets = [0, 0], sizes = [24, 32], strides = [1, 1]} : vector<24x64xf32> to vector<24x32xf32>
    %50 = vector.extract_strided_slice %48 {offsets = [0, 32], sizes = [24, 32], strides = [1, 1]} : vector<24x64xf32> to vector<24x32xf32>
    %51 = arith.mulf %48, %34 : vector<24x64xf32>
    %cst_31 = arith.constant 0.000000e+00 : f32
    %52 = vector.broadcast %cst_31 : f32 to vector<24x32xf32>
    %53 = arith.subf %52, %50 : vector<24x32xf32>
    %54 = tpu.concatenate %53, %49 in 1 : vector<24x32xf32>, vector<24x32xf32> -> vector<24x64xf32>
    %55 = arith.mulf %54, %35 : vector<24x64xf32>
    %56 = arith.addf %51, %55 : vector<24x64xf32>
    %57 = arith.truncf %56 : vector<24x64xf32> to vector<24x64xbf16>
    %58 = vector.extract_strided_slice %15 {offsets = [0, 0], sizes = [24, 64], strides = [1, 1]} : vector<24x128xbf16> to vector<24x64xbf16>
    "tpu.trace_start"() <{level = 10 : i32, message = "qd,kd->qk"}> : () -> ()
    %cst_32 = arith.constant dense<0.000000e+00> : vector<8x24xf32>
    %59 = tpu.matmul %46, %57, %cst_32 {dimension_numbers = #tpu.dot_dimension_numbers<[1], [1], [0], [0], [0, 0, 1, 0], [], []>} : vector<8x64xbf16>, vector<24x64xbf16>, vector<8x24xf32> -> vector<8x24xf32>
    "tpu.trace_stop"() : () -> ()
    %cst_33 = arith.constant 1.250000e-01 : f32
    %60 = vector.broadcast %cst_33 : f32 to vector<8x24xf32>
    %61 = arith.mulf %59, %60 : vector<8x24xf32>
    %cst_34 = arith.constant -1.000000e+30 : f32
    %62 = vector.broadcast %cst_34 : f32 to vector<8x24xf32>
    %63 = arith.select %29, %61, %62 : vector<8x24xi1>, vector<8x24xf32>
    %cst_35 = arith.constant dense<0xFF800000> : vector<8xf32>
    %64 = vector.multi_reduction <maximumf>, %63, %cst_35 [1] : vector<8x24xf32> to vector<8xf32>
    %65 = vector.shape_cast %64 : vector<8xf32> to vector<8x1xf32>
    %66 = vector.broadcast %65 : vector<8x1xf32> to vector<8x24xf32>
    %67 = arith.subf %63, %66 : vector<8x24xf32>
    %68 = math.exp %67 : vector<8x24xf32>
    %cst_36 = arith.constant dense<0.000000e+00> : vector<8xf32>
    %69 = vector.multi_reduction <add>, %68, %cst_36 [1] : vector<8x24xf32> to vector<8xf32>
    %70 = vector.shape_cast %69 : vector<8xf32> to vector<8x1xf32>
    %71 = tpu.reciprocal %70 {approx = true} : vector<8x1xf32> -> vector<8x1xf32>
    %72 = vector.broadcast %71 : vector<8x1xf32> to vector<8x24xf32>
    %73 = arith.mulf %68, %72 : vector<8x24xf32>
    %74 = arith.truncf %73 : vector<8x24xf32> to vector<8x24xbf16>
    "tpu.trace_start"() <{level = 10 : i32, message = "qk,kd->qd"}> : () -> ()
    %cst_37 = arith.constant dense<0.000000e+00> : vector<8x64xf32>
    %75 = tpu.matmul %74, %58, %cst_37 {dimension_numbers = #tpu.dot_dimension_numbers<[1], [0], [0], [1], [0, 0, 1, 1], [], []>} : vector<8x24xbf16>, vector<24x64xbf16>, vector<8x64xf32> -> vector<8x64xf32>
    "tpu.trace_stop"() : () -> ()
    %76 = vector.extract_strided_slice %1 {offsets = [0, 64], sizes = [8, 64], strides = [1, 1]} : vector<8x128xbf16> to vector<8x64xbf16>
    %77 = arith.extf %76 : vector<8x64xbf16> to vector<8x64xf32>
    %78 = vector.extract_strided_slice %77 {offsets = [0, 0], sizes = [8, 32], strides = [1, 1]} : vector<8x64xf32> to vector<8x32xf32>
    %79 = vector.extract_strided_slice %77 {offsets = [0, 32], sizes = [8, 32], strides = [1, 1]} : vector<8x64xf32> to vector<8x32xf32>
    %80 = arith.mulf %77, %31 : vector<8x64xf32>
    %cst_38 = arith.constant 0.000000e+00 : f32
    %81 = vector.broadcast %cst_38 : f32 to vector<8x32xf32>
    %82 = arith.subf %81, %79 : vector<8x32xf32>
    %83 = tpu.concatenate %82, %78 in 1 : vector<8x32xf32>, vector<8x32xf32> -> vector<8x64xf32>
    %84 = arith.mulf %83, %33 : vector<8x64xf32>
    %85 = arith.addf %80, %84 : vector<8x64xf32>
    %86 = arith.truncf %85 : vector<8x64xf32> to vector<8x64xbf16>
    %87 = vector.extract_strided_slice %8 {offsets = [0, 64], sizes = [24, 64], strides = [1, 1]} : vector<24x128xbf16> to vector<24x64xbf16>
    %88 = arith.extf %87 : vector<24x64xbf16> to vector<24x64xf32>
    %89 = vector.extract_strided_slice %88 {offsets = [0, 0], sizes = [24, 32], strides = [1, 1]} : vector<24x64xf32> to vector<24x32xf32>
    %90 = vector.extract_strided_slice %88 {offsets = [0, 32], sizes = [24, 32], strides = [1, 1]} : vector<24x64xf32> to vector<24x32xf32>
    %91 = arith.mulf %88, %34 : vector<24x64xf32>
    %cst_39 = arith.constant 0.000000e+00 : f32
    %92 = vector.broadcast %cst_39 : f32 to vector<24x32xf32>
    %93 = arith.subf %92, %90 : vector<24x32xf32>
    %94 = tpu.concatenate %93, %89 in 1 : vector<24x32xf32>, vector<24x32xf32> -> vector<24x64xf32>
    %95 = arith.mulf %94, %35 : vector<24x64xf32>
    %96 = arith.addf %91, %95 : vector<24x64xf32>
    %97 = arith.truncf %96 : vector<24x64xf32> to vector<24x64xbf16>
    %98 = vector.extract_strided_slice %15 {offsets = [0, 64], sizes = [24, 64], strides = [1, 1]} : vector<24x128xbf16> to vector<24x64xbf16>
    "tpu.trace_start"() <{level = 10 : i32, message = "qd,kd->qk"}> : () -> ()
    %cst_40 = arith.constant dense<0.000000e+00> : vector<8x24xf32>
    %99 = tpu.matmul %86, %97, %cst_40 {dimension_numbers = #tpu.dot_dimension_numbers<[1], [1], [0], [0], [0, 0, 1, 0], [], []>} : vector<8x64xbf16>, vector<24x64xbf16>, vector<8x24xf32> -> vector<8x24xf32>
    "tpu.trace_stop"() : () -> ()
    %cst_41 = arith.constant 1.250000e-01 : f32
    %100 = vector.broadcast %cst_41 : f32 to vector<8x24xf32>
    %101 = arith.mulf %99, %100 : vector<8x24xf32>
    %cst_42 = arith.constant -1.000000e+30 : f32
    %102 = vector.broadcast %cst_42 : f32 to vector<8x24xf32>
    %103 = arith.select %29, %101, %102 : vector<8x24xi1>, vector<8x24xf32>
    %cst_43 = arith.constant dense<0xFF800000> : vector<8xf32>
    %104 = vector.multi_reduction <maximumf>, %103, %cst_43 [1] : vector<8x24xf32> to vector<8xf32>
    %105 = vector.shape_cast %104 : vector<8xf32> to vector<8x1xf32>
    %106 = vector.broadcast %105 : vector<8x1xf32> to vector<8x24xf32>
    %107 = arith.subf %103, %106 : vector<8x24xf32>
    %108 = math.exp %107 : vector<8x24xf32>
    %cst_44 = arith.constant dense<0.000000e+00> : vector<8xf32>
    %109 = vector.multi_reduction <add>, %108, %cst_44 [1] : vector<8x24xf32> to vector<8xf32>
    %110 = vector.shape_cast %109 : vector<8xf32> to vector<8x1xf32>
    %111 = tpu.reciprocal %110 {approx = true} : vector<8x1xf32> -> vector<8x1xf32>
    %112 = vector.broadcast %111 : vector<8x1xf32> to vector<8x24xf32>
    %113 = arith.mulf %108, %112 : vector<8x24xf32>
    %114 = arith.truncf %113 : vector<8x24xf32> to vector<8x24xbf16>
    "tpu.trace_start"() <{level = 10 : i32, message = "qk,kd->qd"}> : () -> ()
    %cst_45 = arith.constant dense<0.000000e+00> : vector<8x64xf32>
    %115 = tpu.matmul %114, %98, %cst_45 {dimension_numbers = #tpu.dot_dimension_numbers<[1], [0], [0], [1], [0, 0, 1, 1], [], []>} : vector<8x24xbf16>, vector<24x64xbf16>, vector<8x64xf32> -> vector<8x64xf32>
    "tpu.trace_stop"() : () -> ()
    %116 = tpu.concatenate %75, %115 in 1 : vector<8x64xf32>, vector<8x64xf32> -> vector<8x128xf32>
    %117 = arith.truncf %116 : vector<8x128xf32> to vector<8x128xbf16>
    %c0_46 = arith.constant 0 : index
    %c0_47 = arith.constant 0 : index
    %c0_48 = arith.constant 0 : index
    %118 = vector.load %arg10[%c0_46, %c0_47, %c0_48] : memref<1x8x128xbf16, #tpu.memory_space<vmem>>, vector<1x8x128xbf16>
    %119 = vector.shape_cast %118 : vector<1x8x128xbf16> to vector<8x128xbf16>
    %120 = vector.shape_cast %117 : vector<8x128xbf16> to vector<1x8x128xbf16>
    tpu.vector_store %arg10[%c0_46, %c0_47, %c0_48], %120 {strides = array<i32>} : memref<1x8x128xbf16, #tpu.memory_space<vmem>>, vector<1x8x128xbf16>,
    return
  }
  func.func @transform_0(%arg0: i32, %arg1: i32) -> (i32, i32, i32) {
    %c0_i32 = arith.constant 0 : i32
    %c0_i32_0 = arith.constant 0 : i32
    return %arg0, %arg1, %c0_i32 : i32, i32, i32
  }
  func.func @transform_1(%arg0: i32, %arg1: i32) -> (i32, i32, i32) {
    %c3_i32 = arith.constant 3 : i32
    %c0_i32 = arith.constant 0 : i32
    %c0_i32_0 = arith.constant 0 : i32
    return %c3_i32, %arg1, %c0_i32 : i32, i32, i32
  }
  func.func @transform_2(%arg0: i32, %arg1: i32) -> (i32, i32, i32) {
    %c0_i32 = arith.constant 0 : i32
    %c0_i32_0 = arith.constant 0 : i32
    %c0_i32_1 = arith.constant 0 : i32
    return %c0_i32, %arg1, %c0_i32_0 : i32, i32, i32
  }
  func.func @transform_3(%arg0: i32, %arg1: i32) -> (i32, i32, i32) {
    %c0_i32 = arith.constant 0 : i32
    %c0_i32_0 = arith.constant 0 : i32
    return %arg0, %arg1, %c0_i32 : i32, i32, i32
  }
  func.func @transform_4(%arg0: i32, %arg1: i32) -> (i32, i32, i32) {
    %c1_i32 = arith.constant 1 : i32
    %0 = arith.minsi %arg0, %c1_i32 : i32
    %c1_i32_0 = arith.constant 1 : i32
    %1 = arith.addi %c1_i32_0, %0 : i32
    %c0_i32 = arith.constant 0 : i32
    %c0_i32_1 = arith.constant 0 : i32
    %c0_i32_2 = arith.constant 0 : i32
    return %1, %c0_i32, %c0_i32_1 : i32, i32, i32
  }
  func.func @transform_5(%arg0: i32, %arg1: i32) -> (i32, i32, i32) {
    %c1_i32 = arith.constant 1 : i32
    %0 = arith.minsi %arg0, %c1_i32 : i32
    %c1_i32_0 = arith.constant 1 : i32
    %1 = arith.addi %c1_i32_0, %0 : i32
    %c0_i32 = arith.constant 0 : i32
    %c0_i32_1 = arith.constant 0 : i32
    %c0_i32_2 = arith.constant 0 : i32
    return %1, %c0_i32, %c0_i32_1 : i32, i32, i32
  }
  func.func @transform_6(%arg0: i32, %arg1: i32) -> (i32, i32) {
    %c0_i32 = arith.constant 0 : i32
    %c0_i32_0 = arith.constant 0 : i32
    %c0_i32_1 = arith.constant 0 : i32
    return %c0_i32, %c0_i32_0 : i32, i32
  }
  func.func @transform_7(%arg0: i32, %arg1: i32) -> (i32, i32) {
    %c0_i32 = arith.constant 0 : i32
    %c0_i32_0 = arith.constant 0 : i32
    %c0_i32_1 = arith.constant 0 : i32
    return %c0_i32, %c0_i32_0 : i32, i32
  }
  func.func @transform_8(%arg0: i32, %arg1: i32) -> (i32, i32, i32) {
    %c0_i32 = arith.constant 0 : i32
    %c0_i32_0 = arith.constant 0 : i32
    return %arg0, %arg1, %c0_i32 : i32, i32, i32
  }
}

module attributes {stable_mosaic.version = 11 : i64} {
  func.func @_oproj_mlp_kernel(%arg0: i32, %arg1: memref<1x8x128xbf16, #tpu.memory_space<vmem>>, %arg2: memref<1x8x128xbf16, #tpu.memory_space<vmem>>, %arg3: memref<128x128xbf16, #tpu.memory_space<vmem>>, %arg4: memref<1x128xbf16, #tpu.memory_space<vmem>>, %arg5: memref<128x256xbf16, #tpu.memory_space<vmem>>, %arg6: memref<128x256xbf16, #tpu.memory_space<vmem>>, %arg7: memref<256x128xbf16, #tpu.memory_space<vmem>>, %arg8: memref<1x8x128xbf16, #tpu.memory_space<vmem>>) attributes {dimension_semantics = [#tpu.dimension_semantics<parallel>], iteration_bounds = array<i64: 3>, scalar_prefetch = 0 : i64, scratch_operands = 0 : i64, tpu.core_type = #tpu.core_type<tc>, window_params = [{transform_indices = @transform_0, window_bounds = array<i64: 1, 8, 128>}, {transform_indices = @transform_1, window_bounds = array<i64: 1, 8, 128>}, {pipeline_mode = #tpu.pipeline_mode<synchronous>, transform_indices = @transform_2, window_bounds = array<i64: 128, 128>}, {pipeline_mode = #tpu.pipeline_mode<synchronous>, transform_indices = @transform_3, window_bounds = array<i64: 1, 128>}, {pipeline_mode = #tpu.pipeline_mode<synchronous>, transform_indices = @transform_4, window_bounds = array<i64: 128, 256>}, {pipeline_mode = #tpu.pipeline_mode<synchronous>, transform_indices = @transform_5, window_bounds = array<i64: 128, 256>}, {pipeline_mode = #tpu.pipeline_mode<synchronous>, transform_indices = @transform_6, window_bounds = array<i64: 256, 128>}, {transform_indices = @transform_7, window_bounds = array<i64: 1, 8, 128>}]} {
    %c0 = arith.constant 0 : index
    %c0_0 = arith.constant 0 : index
    %c0_1 = arith.constant 0 : index
    %0 = vector.load %arg1[%c0, %c0_0, %c0_1] : memref<1x8x128xbf16, #tpu.memory_space<vmem>>, vector<1x8x128xbf16>
    %1 = vector.shape_cast %0 : vector<1x8x128xbf16> to vector<8x128xbf16>
    %c0_2 = arith.constant 0 : index
    %c0_3 = arith.constant 0 : index
    %c0_4 = arith.constant 0 : index
    %2 = vector.load %arg2[%c0_2, %c0_3, %c0_4] : memref<1x8x128xbf16, #tpu.memory_space<vmem>>, vector<1x8x128xbf16>
    %3 = vector.shape_cast %2 : vector<1x8x128xbf16> to vector<8x128xbf16>
    %4 = arith.extf %3 : vector<8x128xbf16> to vector<8x128xf32>
    %c0_5 = arith.constant 0 : index
    %c0_6 = arith.constant 0 : index
    %5 = vector.load %arg3[%c0_5, %c0_6] : memref<128x128xbf16, #tpu.memory_space<vmem>>, vector<128x128xbf16>
    %cst = arith.constant dense<0.000000e+00> : vector<8x128xf32>
    %6 = tpu.matmul %1, %5, %cst {dimension_numbers = #tpu.dot_dimension_numbers<[1], [0], [0], [1], [0, 0, 1, 1], [], []>} : vector<8x128xbf16>, vector<128x128xbf16>, vector<8x128xf32> -> vector<8x128xf32>
    %7 = arith.addf %4, %6 : vector<8x128xf32>
    %8 = arith.mulf %7, %7 : vector<8x128xf32>
    %cst_7 = arith.constant dense<0.000000e+00> : vector<8xf32>
    %9 = vector.multi_reduction <add>, %8, %cst_7 [1] : vector<8x128xf32> to vector<8xf32>
    %10 = vector.shape_cast %9 : vector<8xf32> to vector<8x1xf32>
    %cst_8 = arith.constant 1.280000e+02 : f32
    %11 = vector.broadcast %cst_8 : f32 to vector<8x1xf32>
    %12 = arith.divf %10, %11 : vector<8x1xf32>
    %cst_9 = arith.constant 9.99999974E-6 : f32
    %13 = vector.broadcast %cst_9 : f32 to vector<8x1xf32>
    %14 = arith.addf %12, %13 : vector<8x1xf32>
    %15 = math.rsqrt %14 : vector<8x1xf32>
    %16 = vector.broadcast %15 : vector<8x1xf32> to vector<8x128xf32>
    %17 = arith.mulf %7, %16 : vector<8x128xf32>
    %c0_10 = arith.constant 0 : index
    %c0_11 = arith.constant 0 : index
    %18 = vector.load %arg4[%c0_10, %c0_11] : memref<1x128xbf16, #tpu.memory_space<vmem>>, vector<1x128xbf16>
    %19 = arith.extf %18 : vector<1x128xbf16> to vector<1x128xf32>
    %20 = vector.broadcast %19 : vector<1x128xf32> to vector<8x128xf32>
    %21 = arith.mulf %17, %20 : vector<8x128xf32>
    %22 = arith.truncf %21 : vector<8x128xf32> to vector<8x128xbf16>
    %c0_12 = arith.constant 0 : index
    %c0_13 = arith.constant 0 : index
    %23 = vector.load %arg5[%c0_12, %c0_13] : memref<128x256xbf16, #tpu.memory_space<vmem>>, vector<128x256xbf16>
    %cst_14 = arith.constant dense<0.000000e+00> : vector<8x256xf32>
    %24 = tpu.matmul %22, %23, %cst_14 {dimension_numbers = #tpu.dot_dimension_numbers<[1], [0], [0], [1], [0, 0, 1, 1], [], []>} : vector<8x128xbf16>, vector<128x256xbf16>, vector<8x256xf32> -> vector<8x256xf32>
    %c0_15 = arith.constant 0 : index
    %c0_16 = arith.constant 0 : index
    %25 = vector.load %arg6[%c0_15, %c0_16] : memref<128x256xbf16, #tpu.memory_space<vmem>>, vector<128x256xbf16>
    %cst_17 = arith.constant dense<0.000000e+00> : vector<8x256xf32>
    %26 = tpu.matmul %22, %25, %cst_17 {dimension_numbers = #tpu.dot_dimension_numbers<[1], [0], [0], [1], [0, 0, 1, 1], [], []>} : vector<8x128xbf16>, vector<128x256xbf16>, vector<8x256xf32> -> vector<8x256xf32>
    %27 = arith.negf %24 : vector<8x256xf32>
    %28 = math.exp %27 : vector<8x256xf32>
    %cst_18 = arith.constant 1.000000e+00 : f32
    %29 = vector.broadcast %cst_18 : f32 to vector<8x256xf32>
    %30 = arith.addf %29, %28 : vector<8x256xf32>
    %31 = arith.divf %29, %30 : vector<8x256xf32>
    %32 = arith.mulf %24, %31 : vector<8x256xf32>
    %33 = arith.mulf %32, %26 : vector<8x256xf32>
    %34 = arith.truncf %33 : vector<8x256xf32> to vector<8x256xbf16>
    %c0_19 = arith.constant 0 : index
    %c0_20 = arith.constant 0 : index
    %35 = vector.load %arg7[%c0_19, %c0_20] : memref<256x128xbf16, #tpu.memory_space<vmem>>, vector<256x128xbf16>
    %cst_21 = arith.constant dense<0.000000e+00> : vector<8x128xf32>
    %36 = tpu.matmul %34, %35, %cst_21 {dimension_numbers = #tpu.dot_dimension_numbers<[1], [0], [0], [1], [0, 0, 1, 1], [], []>} : vector<8x256xbf16>, vector<256x128xbf16>, vector<8x128xf32> -> vector<8x128xf32>
    %37 = arith.addf %7, %36 : vector<8x128xf32>
    %38 = arith.truncf %37 : vector<8x128xf32> to vector<8x128xbf16>
    %c0_22 = arith.constant 0 : index
    %c0_23 = arith.constant 0 : index
    %c0_24 = arith.constant 0 : index
    %39 = vector.load %arg8[%c0_22, %c0_23, %c0_24] : memref<1x8x128xbf16, #tpu.memory_space<vmem>>, vector<1x8x128xbf16>
    %40 = vector.shape_cast %39 : vector<1x8x128xbf16> to vector<8x128xbf16>
    %41 = vector.shape_cast %38 : vector<8x128xbf16> to vector<1x8x128xbf16>
    tpu.vector_store %arg8[%c0_22, %c0_23, %c0_24], %41 {strides = array<i32>} : memref<1x8x128xbf16, #tpu.memory_space<vmem>>, vector<1x8x128xbf16>,
    return
  }
  func.func @transform_0(%arg0: i32) -> (i32, i32, i32) {
    %c0_i32 = arith.constant 0 : i32
    %c0_i32_0 = arith.constant 0 : i32
    %c0_i32_1 = arith.constant 0 : i32
    return %arg0, %c0_i32, %c0_i32_0 : i32, i32, i32
  }
  func.func @transform_1(%arg0: i32) -> (i32, i32, i32) {
    %c0_i32 = arith.constant 0 : i32
    %c0_i32_0 = arith.constant 0 : i32
    %c0_i32_1 = arith.constant 0 : i32
    return %arg0, %c0_i32, %c0_i32_0 : i32, i32, i32
  }
  func.func @transform_2(%arg0: i32) -> (i32, i32) {
    %c0_i32 = arith.constant 0 : i32
    %c0_i32_0 = arith.constant 0 : i32
    %c0_i32_1 = arith.constant 0 : i32
    return %c0_i32, %c0_i32_0 : i32, i32
  }
  func.func @transform_3(%arg0: i32) -> (i32, i32) {
    %c0_i32 = arith.constant 0 : i32
    %c0_i32_0 = arith.constant 0 : i32
    %c0_i32_1 = arith.constant 0 : i32
    return %c0_i32, %c0_i32_0 : i32, i32
  }
  func.func @transform_4(%arg0: i32) -> (i32, i32) {
    %c0_i32 = arith.constant 0 : i32
    %c0_i32_0 = arith.constant 0 : i32
    %c0_i32_1 = arith.constant 0 : i32
    return %c0_i32, %c0_i32_0 : i32, i32
  }
  func.func @transform_5(%arg0: i32) -> (i32, i32) {
    %c0_i32 = arith.constant 0 : i32
    %c0_i32_0 = arith.constant 0 : i32
    %c0_i32_1 = arith.constant 0 : i32
    return %c0_i32, %c0_i32_0 : i32, i32
  }
  func.func @transform_6(%arg0: i32) -> (i32, i32) {
    %c0_i32 = arith.constant 0 : i32
    %c0_i32_0 = arith.constant 0 : i32
    %c0_i32_1 = arith.constant 0 : i32
    return %c0_i32, %c0_i32_0 : i32, i32
  }
  func.func @transform_7(%arg0: i32) -> (i32, i32, i32) {
    %c0_i32 = arith.constant 0 : i32
    %c0_i32_0 = arith.constant 0 : i32
    %c0_i32_1 = arith.constant 0 : i32
    return %arg0, %c0_i32, %c0_i32_0 : i32, i32, i32
  }
}

module attributes {stable_mosaic.version = 11 : i64} {
  func.func @_memgate_norm_kernel(%arg0: memref<16x128xbf16, #tpu.memory_space<vmem>>, %arg1: memref<16x128xbf16, #tpu.memory_space<vmem>>, %arg2: memref<16x128xbf16, #tpu.memory_space<vmem>>, %arg3: memref<1x128xbf16, #tpu.memory_space<vmem>>, %arg4: memref<16x128xbf16, #tpu.memory_space<vmem>>) attributes {dimension_semantics = [], scalar_prefetch = 0 : i64, scratch_operands = 0 : i64, tpu.core_type = #tpu.core_type<tc>} {
    %c0 = arith.constant 0 : index
    %c0_0 = arith.constant 0 : index
    %0 = vector.load %arg2[%c0, %c0_0] : memref<16x128xbf16, #tpu.memory_space<vmem>>, vector<16x128xbf16>
    %1 = arith.extf %0 : vector<16x128xbf16> to vector<16x128xf32>
    %cst = arith.constant 1.000000e+00 : f32
    %2 = vector.broadcast %cst : f32 to vector<16x128xf32>
    %3 = arith.mulf %1, %2 : vector<16x128xf32>
    %4 = arith.negf %3 : vector<16x128xf32>
    %5 = math.exp %4 : vector<16x128xf32>
    %cst_1 = arith.constant 1.000000e+00 : f32
    %6 = vector.broadcast %cst_1 : f32 to vector<16x128xf32>
    %7 = arith.addf %6, %5 : vector<16x128xf32>
    %8 = arith.divf %6, %7 : vector<16x128xf32>
    %c0_2 = arith.constant 0 : index
    %c0_3 = arith.constant 0 : index
    %9 = vector.load %arg0[%c0_2, %c0_3] : memref<16x128xbf16, #tpu.memory_space<vmem>>, vector<16x128xbf16>
    %10 = arith.extf %9 : vector<16x128xbf16> to vector<16x128xf32>
    %11 = arith.mulf %10, %8 : vector<16x128xf32>
    %c0_4 = arith.constant 0 : index
    %c0_5 = arith.constant 0 : index
    %12 = vector.load %arg1[%c0_4, %c0_5] : memref<16x128xbf16, #tpu.memory_space<vmem>>, vector<16x128xbf16>
    %13 = arith.extf %12 : vector<16x128xbf16> to vector<16x128xf32>
    %cst_6 = arith.constant 1.000000e+00 : f32
    %14 = vector.broadcast %cst_6 : f32 to vector<16x128xf32>
    %15 = arith.subf %14, %8 : vector<16x128xf32>
    %16 = arith.mulf %13, %15 : vector<16x128xf32>
    %17 = arith.addf %11, %16 : vector<16x128xf32>
    %18 = arith.mulf %17, %17 : vector<16x128xf32>
    %cst_7 = arith.constant dense<0.000000e+00> : vector<16xf32>
    %19 = vector.multi_reduction <add>, %18, %cst_7 [1] : vector<16x128xf32> to vector<16xf32>
    %20 = vector.shape_cast %19 : vector<16xf32> to vector<16x1xf32>
    %cst_8 = arith.constant 1.280000e+02 : f32
    %21 = vector.broadcast %cst_8 : f32 to vector<16x1xf32>
    %22 = arith.divf %20, %21 : vector<16x1xf32>
    %cst_9 = arith.constant 9.99999974E-6 : f32
    %23 = vector.broadcast %cst_9 : f32 to vector<16x1xf32>
    %24 = arith.addf %22, %23 : vector<16x1xf32>
    %25 = math.rsqrt %24 : vector<16x1xf32>
    %26 = vector.broadcast %25 : vector<16x1xf32> to vector<16x128xf32>
    %27 = arith.mulf %17, %26 : vector<16x128xf32>
    %28 = arith.truncf %27 : vector<16x128xf32> to vector<16x128xbf16>
    %c0_10 = arith.constant 0 : index
    %c0_11 = arith.constant 0 : index
    %29 = vector.load %arg3[%c0_10, %c0_11] : memref<1x128xbf16, #tpu.memory_space<vmem>>, vector<1x128xbf16>
    %30 = vector.broadcast %29 : vector<1x128xbf16> to vector<16x128xbf16>
    %31 = arith.mulf %28, %30 : vector<16x128xbf16>
    %c0_12 = arith.constant 0 : index
    %c0_13 = arith.constant 0 : index
    %32 = vector.load %arg4[%c0_12, %c0_13] : memref<16x128xbf16, #tpu.memory_space<vmem>>, vector<16x128xbf16>
    tpu.vector_store %arg4[%c0_12, %c0_13], %31 {strides = array<i32>} : memref<16x128xbf16, #tpu.memory_space<vmem>>, vector<16x128xbf16>,
    return
  }
}

</mosaic_0001>

<bundles_post_ra>
// kernel: split.1
= control target key start
LH: loop header
LB: loop body
LE: loop exit
PB: predicated region body
PF: predicated region fallthrough
CT: control target
= control target key end

     0   :  { %s23_s0 = inlined_call_operand.vmem [shape: bf16[2,8,128], index: 0, kind: input, shape index: {}]   ;;  %s24_s1 = inlined_call_operand.vmem [shape: bf16[1,8,128], index: 1, kind: output, shape index: {}]  }
   0x1   :  { %v2_v0 = vld [vmem:[%s23_s0] sm:$0xf] }
   0x2   :  { %6 = vst [vmem:[%s24_s1] sm:$0xf] %v2_v0 }

// kernel: encoder_forward.7
= control target key start
LH: loop header
LB: loop body
LE: loop exit
PB: predicated region body
PF: predicated region fallthrough
CT: control target
= control target key end

     0   :  { %v69_v33 = vlaneseq  ;;  %s158_s2 = inlined_call_operand.vmem [shape: bf16[16,128], index: 2, kind: input, shape index: {}]   ;;  %s159_s0 = inlined_call_operand.vmem [shape: bf16[16,128], index: 0, kind: input, shape index: {}, may-alias: {0,4}]   ;;  %s160_s1 = inlined_call_operand.vmem [shape: bf16[16,128], index: 1, kind: input, shape index: {}]   ;;  %s161_s3 = inlined_call_operand.vmem [shape: bf16[1,128], index: 3, kind: input, shape index: {}]   ;;  %s162_s4 = inlined_call_operand.vmem [shape: bf16[16,128], index: 4, kind: output, shape index: {}, may-alias: {0,4}]  }
   0x1   :  { %v92_v0 = vld [vmem:[%s158_s2] sm:$0xff]  }
   0x2   :  { %v93_v1 = vunpack.c.l.bf16 %v92_v0  ;;  %v94_v2 = vunpack.c.h.bf16 %v92_v0  ;;  %v96_v9 = vld [vmem:[%s159_s0] sm:$0xff]   ;;  %v70_v34 = vshrl.u32 %v69_v33, 7 }
   0x3   :  { %v100_v10 = vld [vmem:[%s160_s1] sm:$0xff]   ;;  %v97_v11 = vunpack.c.l.bf16 %v96_v9  ;;  %v98_v12 = vunpack.c.h.bf16 %v96_v9 }
   0x4   :  { %v87_v3 = vmul.f32 -1.442695, %v93_v1  ;;  %v88_v4 = vmul.f32 -1.442695, %v94_v2  ;;  %v101_v13 = vunpack.c.l.bf16 %v100_v10  ;;  %v102_v15 = vunpack.c.h.bf16 %v100_v10  ;;  %v65_v35 = vld [vmem:[%s161_s3] sm:$0x1] }
   0x5   :  { %v67_v36 = vpack.i.b16 %v65_v35, %v65_v35  ;;  %v71_v37 = vsub.s32 0, %v70_v34 }
   0x6   :  { %103 = vpow2.f32 %v87_v3 }
   0x7   :  { %105 = vpow2.f32 %v88_v4  ;;  %v72_v41 = vrot.slane %v67_v36, %v71_v37 }
  0x13   :  { %v104_v5 = vpop.eup %103 }
  0x14   :  { %v106_v6 = vpop.eup %105  ;;  %v27_v7 = vadd.f32 1.0, %v104_v5 }
  0x15   :  { %v28_v8 = vadd.f32 1.0, %v106_v6 }
  0x16   :  { %107 = vrcp.f32 %v27_v7 }
  0x17   :  { %109 = vrcp.f32 %v28_v8 }
  0x23   :  { %v108_v14 = vpop.eup %107 }
  0x24   :  { %v110_v16 = vpop.eup %109  ;;  %v37_v17 = vmul.f32 %v108_v14, %v97_v11  ;;  %v43_v18 = vsub.f32 1.0, %v108_v14 }
  0x25   :  { %v38_v19 = vmul.f32 %v110_v16, %v98_v12  ;;  %v44_v20 = vsub.f32 1.0, %v110_v16 }
  0x26   :  { %v45_v21 = vmul.f32 %v101_v13, %v43_v18 }
  0x27   :  { %v46_v22 = vmul.f32 %v102_v15, %v44_v20 }
  0x28   :  { %v47_v23 = vadd.f32 %v45_v21, %v37_v17 }
  0x29   :  { %v48_v24 = vadd.f32 %v46_v22, %v38_v19 }
  0x2a   :  { %v49_v25 = vmul.f32 %v47_v23, %v47_v23 }
  0x2b   :  { %v50_v26 = vmul.f32 %v48_v24, %v48_v24 }
  0x2c   :  { %51 = vadd.xlane.f32.xlu0 %v49_v25 }
  0x30   :  { %53 = vadd.xlane.f32.xlu0 %v50_v26 }
  0xb5   :  { %v52_v27 = vpop.xlane.xlu0 %51 }
  0xb6   :  { %v56_v28 = vmul.f32 0.0078125, %v52_v27 }
  0xb8   :  { %v58_v29 = vadd.f32 1e-05, %v56_v28 }
  0xb9   :  { %v54_v30 = vpop.xlane.xlu0 %53 }
  0xba   :  { %v57_v31 = vmul.f32 0.0078125, %v54_v30  ;;  %111 = vrsqrt.f32 %v58_v29 }
  0xbc   :  { %v59_v32 = vadd.f32 1e-05, %v57_v31 }
  0xbe   :  { %113 = vrsqrt.f32 %v59_v32 }
  0xc7   :  { %v112_v38 = vpop.eup %111 }
  0xc8   :  { %v62_v40 = vmul.f32 %v112_v38, %v47_v23 }
  0xcb   :  { %v114_v39 = vpop.eup %113 }
  0xcc   :  { %v63_v42 = vmul.f32 %v114_v39, %v48_v24 }
  0xce   :  { %v64_v43 = vpack.c.bf16 %v63_v42, %v62_v40 }
  0xd0   :  { %v73_v44 = vmul.bf16 %v72_v41, %v64_v43 }
  0xd2   :  { %v89_v45 = vcombine.low %v73_v44, %v73_v44  ;;  %v90_v46 = vcombine.high %v73_v44, %v73_v44 }
  0xd4   :  { %81 = vst [vmem:[%s162_s4] sm:$0xf] %v89_v45  ;;  %82 = vst [vmem:[%s162_s4 + $0x4] sm:$0xf] %v90_v46 }

// kernel: encoder_forward.4
= control target key start
LH: loop header
LB: loop body
LE: loop exit
PB: predicated region body
PF: predicated region fallthrough
CT: control target
= control target key end

     0   :  { %11 = vsyncpa [#allocation3], 0  ;;  %s1130_s0 = inlined_call_operand.vmem [shape: bf16[4,8,128], index: 0, kind: input, shape index: {}]   ;;  %s1131_s1 = inlined_call_operand.vmem [shape: bf16[1,128], index: 1, kind: input, shape index: {}]   ;;  %s1132_s2 = inlined_call_operand.vmem [shape: bf16[3,128,128], index: 2, kind: input, shape index: {}]   ;;  %s1133_s3 = inlined_call_operand.hbm [shape: bf16[4,128,256], index: 3, kind: input, shape index: {}]   ;;  %s1134_s4 = inlined_call_operand.vmem [shape: bf16[4,8,128], index: 4, kind: output, shape index: {0}]   ;;  %s1135_s5 = inlined_call_operand.vmem [shape: bf16[4,8,256], index: 5, kind: output, shape index: {1}]  }
   0x1   :  { %13 = vsyncpa [#allocation3 + $0x1], 0  ;;  %s960_s18 = smov 0   ;;  %s962_s19 = smov 0  }
   0x2   :  { %s964_s20 = smov 0   ;;  %s966_s21 = smov 0  }
   0x3 LB: > { %s979_s22 = sadd.s32 4294967295, %s922_s21   ;;  %s982_s23 = sadd.s32 1, %s922_s21   ;;  %s922_s21 = sphi %s966_s21, %s1144_s21   ;;  %s918_s20 = sphi %s964_s20, %s1143_s20   ;;  %s914_s19 = sphi %s962_s19, %s1142_s19   ;;  %s910_s18 = sphi %s960_s18, %s1141_s18  }
   0x4   : > { %s100_s24 = ssub.s32 %s922_s21, %s982_s23  ;;  %s103_s25 = sadd.s32 1, %s918_s20 }
   0x5   : > { %p101_p0 = scmp.eq.s32.totalorder %s100_s24, 0  ;;  %p110_p1 = scmp.ne.s32.totalorder %s918_s20, %s914_s19 }
   0x6   : > { %p111_p2 = scmp.eq.s32.totalorder %s922_s21, 0  ;;  %p116_p3 = scmp.ne.s32.totalorder %s914_s19, %s910_s18 }
   0x7   : > { %s992_s26 = scalar_select %p101_p0, %s918_s20, %s103_s25  }
   0x8   : > { %p112_p4 = por %p111_p2, %p110_p1  ;;  %p117_p5 = scmp.eq.s32.totalorder %s979_s22, 0 }
   0x9   : > { %p788_p6 = scmp.lt.s32.totalorder %s922_s21, 4  ;;  %s214_s28 = sand.u32 1, %s918_s20  }
   0xa   : > { %p996_p7 = por %p117_p5, %p116_p3  ;;  %s708_s29 = sshll.u32 %s214_s28, 7 }
   0xb   : > { %s749_s30 = sshll.u32 %s922_s21, 11  ;;  %s218_s9 = scalar_lea.vmem [#allocation2], %s708_s29 }
   0xc   : > { %s1137_s27 = scalar_select %p996_p7, 1, 0 }
   0xd   : > { %s1005_s8 = scalar_lea.hbm %s1133_s3, %s749_s30  ;;  %s225_s10 = sshll.u32 %s218_s9, 4  ;;  %s1007_s10 = int_to_ptr.vmem [resolvable:$true] %s225_s10 }
   0xe   : > { %p1009_p8 = pnand %p788_p6, %p112_p4  ;;  %s1014_s12 = scalar_lea.sflag [#allocation3], %s214_s28 }
   0xf   : > { %s860_s13 = scalar_lea.hbm %s1005_s8, 2048  ;;  %s865_s16 = scalar_lea.hbm %s1133_s3, 8192 }
  0x10   : > { %p861_p10 = scmp.ne.s32.totalorder %s1005_s8, %s860_s13  ;;  %p862_p11 = pneg %p1009_p8 }
  0x11   : > { %p866_p0 = scmp.lt.s32.totalorder %s1005_s8, %s1133_s3  ;;  %p867_p1 = scmp.lt.s32.totalorder %s865_s16, %s860_s13 }
  0x12   : > { %p863_p12 = pnand %p862_p11, %p861_p10 }
  0x13   : > { %p868_p2 = por %p867_p1, %p866_p0 }
  0x14   : > { %p864_p13 = pneg %p863_p12 }
  0x16   : > { %p869_p3 = pnand %p868_p2, %p864_p13 }
  0x18   : > { %872 = shalt.err (!%p869_p3)
}
  0x19   : > { %s873_s24 = scalar_lea.vmem %s1007_s10, 2048  ;;  %s924_s25 = smov [#allocation2]  }
  0x1a   : > { %p874_p4 = scmp.ne.s32.totalorder %s1007_s10, %s873_s24  ;;  %s878_s28 = sshll.u32 %s924_s25, 4  ;;  %s879_s28 = int_to_ptr.vmem [resolvable:$false] %s878_s28 }
  0x1b   : > { %s880_s29 = scalar_lea.vmem %s879_s28, 4096  ;;  %p881_p10 = scmp.lt.s32.totalorder %s1007_s10, %s879_s28 }
  0x1c   : > { %p876_p5 = pnand %p874_p4, %p862_p11  ;;  %p882_p12 = scmp.lt.s32.totalorder %s880_s29, %s873_s24 }
  0x1e   : > { %p877_p6 = pneg %p876_p5  ;;  %p883_p9 = por %p882_p12, %p881_p10 }
  0x20   : > { %p884_p7 = pnand %p883_p9, %p877_p6 }
  0x22   : > { %887 = shalt.err (!%p884_p7)
}
  0x23   : > { %s925_s30 = smov 128   ;;  %s926_s6 = smov 8  }
  0x24   : > { %787 = dma.hbm_to_vmem [thread:$0]  (!%p1009_p8), %s1005_s8, 2048, %s1007_s10, %s1014_s12, %s925_s30, %s925_s30, %s926_s6  }
  0x25   : > { %p233_p11 = scmp.lt.s32.totalorder %s922_s21, 5  ;;  %p1139_p13 = scmp.ge.s32.totalorder %s922_s21, 1 }
  0x27   : > { %p234_p0 = pnand %p1139_p13, %p233_p11 }
  0x28   : > { %s239_s7 = sand.u32 (!%p234_p0), 1, %s914_s19   ;;  %p1140_p7 = scmp.ne.s32.totalorder (!%p234_p0), %s1137_s27, 0 }
  0x29   : > { %237 = sbr.rel (%p234_p0) target bundleno = 420 (0x1a4), region = 36  ;;  %s712_s9 = sshll.u32 (!%p234_p0), %s239_s7, 7 }
  0x2a   : > { %s240_s13 = scalar_lea.sflag (!%p234_p0), [#allocation3], %s239_s7  ;;  %s1039_s14 = scalar_lea.vmem (!%p234_p0), [#allocation2], %s712_s9 }
  0x2e   : > { %905 = dma.done.wait (%p1140_p7), %s240_s13, 2048  }
  0x2f   : > { %907 = vsyncadd (%p1140_p7), %s240_s13, 4294965248  ;;  %p285_p8 = scmp.lt.s32.totalorder %s979_s22, 3  ;;  %p289_p9 = scmp.lt.s32.totalorder %s979_s22, 2  ;;  %v927_v0 = vmov 0.0   ;;  %v826_v3 = vld [vmem:[%s1039_s14 + $0x74] ss:$8 sps:$4 sm:$0xff]   ;;  %v320_v32 = vlaneseq }
  0x30   : > { %762 = vmatprep.subr.bf16.mxu1 %v927_v0  ;;  %v828_v4 = vld [vmem:[%s1039_s14 + $0x70] ss:$8 sps:$4 sm:$0xff]   ;;  %v830_v5 = vld [vmem:[%s1039_s14 + $0x64] ss:$8 sps:$4 sm:$0xff]   ;;  %v832_v6 = vld [vmem:[%s1039_s14 + $0x60] ss:$8 sps:$4 sm:$0xff]   ;;  %427 = vmatprep.subr.bf16.mxu0 %v826_v3 }
  0x31   : > { %s1051_s21 = scalar_select %p285_p8, %s979_s22, 3  ;;  %428 = vmatpush1.bf16.msra.mxu0 %v828_v4  ;;  %v834_v10 = vld [vmem:[%s1039_s14 + $0x54] ss:$8 sps:$4 sm:$0xff]   ;;  %v836_v11 = vld [vmem:[%s1039_s14 + $0x50] ss:$8 sps:$4 sm:$0xff]   ;;  %v928_v17 = vmov 0  }
  0x32   : > { %s290_s27 = scalar_select %p289_p9, %s979_s22, 2  ;;  %429 = vmatprep.subr.bf16.mxu0 %v830_v5  ;;  %v838_v13 = vld [vmem:[%s1039_s14 + $0x44] ss:$8 sps:$4 sm:$0xff]   ;;  %v840_v14 = vld [vmem:[%s1039_s14 + $0x40] ss:$8 sps:$4 sm:$0xff]   ;;  %459 = vmatprep.mubr.bf16.mxu0 %v928_v17  ;;  %vm929_vm0 = vmmov 0  }
  0x33   : > { %s713_s8 = sshll.u32 %s1051_s21, 2  ;;  %v842_v16 = vld [vmem:[%s1039_s14 + $0x34] ss:$8 sps:$4 sm:$0xff]   ;;  %v844_v18 = vld [vmem:[%s1039_s14 + $0x30] ss:$8 sps:$4 sm:$0xff]   ;;  %778 = vmatprep.mubr.msk.bf16.mxu1 %vm929_vm0, %v927_v0  ;;  %v321_v33 = vshrl.u32 %v320_v32, 7 }
  0x34   : > { %s288_s12 = scalar_lea.vmem %s1130_s0, %s713_s8  ;;  %s1146_s27 = smov (!%p289_p9, %s290_s27), 2  ;;  %v846_v20 = vld [vmem:[%s1039_s14 + $0x24] ss:$8 sps:$4 sm:$0xff]   ;;  %v848_v21 = vld [vmem:[%s1039_s14 + $0x20] ss:$8 sps:$4 sm:$0xff]  }
  0x35   : > { %v308_v1 = vld [vmem:[%s288_s12] sm:$0xf]  ;;  %s750_s15 = sshll.u32 %s1146_s27, 6  ;;  %430 = vmatpush1.bf16.msra.mxu0 %v832_v6  ;;  %v850_v23 = vld [vmem:[%s1039_s14 + $0x14] ss:$8 sps:$4 sm:$0xff]   ;;  %v322_v36 = vsub.s32 0, %v321_v33  ;;  %s301_s22 = scalar_lea.vmem %s1134_s4, %s713_s8 }
  0x36   : > { %v1060_v2 = vunpack.c.l.bf16 %v308_v1  ;;  %s1067_s18 = scalar_lea.vmem %s1132_s2, %s750_s15  ;;  %431 = vmatprep.subr.bf16.mxu0 %v834_v10  ;;  %v852_v24 = vld [vmem:[%s1039_s14 + $0x10] ss:$8 sps:$4 sm:$0xff]   ;;  %v854_v26 = vld [vmem:[%s1039_s14 + $0x4] ss:$8 sps:$4 sm:$0xff]   ;;  %v856_v27 = vld [vmem:[%s1039_s14] ss:$8 sps:$4 sm:$0xff]  }
  0x37   : > { %v829_v8 = vld [vmem:[%s1067_s18 + $0x38] sm:$0xff]   ;;  %v833_v9 = vld [vmem:[%s1067_s18 + $0x30] sm:$0xff]   ;;  %v837_v12 = vld [vmem:[%s1067_s18 + $0x28] sm:$0xff]   ;;  %s326_s28 = scalar_select %p285_p8, 1, 0 }
  0x38   : > { %v310_v7 = vmul.f32 %v1060_v2, %v1060_v2  ;;  %763 = vmatpush3.bf16.msra.mxu1 %v829_v8  ;;  %v841_v15 = vld [vmem:[%s1067_s18 + $0x20] sm:$0xff]   ;;  %v845_v19 = vld [vmem:[%s1067_s18 + $0x18] sm:$0xff]   ;;  %v849_v22 = vld [vmem:[%s1067_s18 + $0x10] sm:$0xff]   ;;  %s751_s29 = sshll.u32 %s1051_s21, 3 }
  0x39   : > { %764 = vmatprep.subr.bf16.mxu1 %v927_v0  ;;  %432 = vmatpush1.bf16.msra.mxu0 %v836_v11  ;;  %v853_v25 = vld [vmem:[%s1067_s18 + $0x8] sm:$0xff]   ;;  %v857_v28 = vld [vmem:[%s1067_s18] sm:$0xff]   ;;  %v327_v38 = vstv %s326_s28  ;;  %s306_s13 = scalar_lea.vmem %s1135_s5, %s751_s29 }
  0x3a   : > { %311 = vadd.xlane.f32.xlu0 %v310_v7  ;;  %433 = vmatprep.subr.bf16.mxu0 %v838_v13  ;;  %v318_v34 = vld [vmem:[%s1131_s1] sm:$0x1]  ;;  %vm328_vm1 = vcmp.eq.s32.totalorder %v327_v38, 1 }
  0x3b   : > { %v319_v35 = vunpack.c.l.bf16 %v318_v34 }
  0x3c   : > { %765 = vmatpush3.bf16.msra.mxu1 %v833_v9 }
  0x3d   : > { %766 = vmatprep.subr.bf16.mxu1 %v927_v0  ;;  %434 = vmatpush1.bf16.msra.mxu0 %v840_v14  ;;  %v323_v37 = vrot.slane %v319_v35, %v322_v36 }
  0x3e   : > { %435 = vmatprep.subr.bf16.mxu0 %v842_v16 }
  0x40   : > { %767 = vmatpush3.bf16.msra.mxu1 %v837_v12 }
  0x41   : > { %768 = vmatprep.subr.bf16.mxu1 %v927_v0  ;;  %436 = vmatpush1.bf16.msra.mxu0 %v844_v18 }
  0x42   : > { %437 = vmatprep.subr.bf16.mxu0 %v846_v20 }
  0x44   : > { %769 = vmatpush3.bf16.msra.mxu1 %v841_v15 }
  0x45   : > { %770 = vmatprep.subr.bf16.mxu1 %v927_v0  ;;  %438 = vmatpush1.bf16.msra.mxu0 %v848_v21 }
  0x46   : > { %439 = vmatprep.subr.bf16.mxu0 %v850_v23 }
  0x48   : > { %771 = vmatpush3.bf16.msra.mxu1 %v845_v19 }
  0x49   : > { %772 = vmatprep.subr.bf16.mxu1 %v927_v0  ;;  %440 = vmatpush1.bf16.msra.mxu0 %v852_v24 }
  0x4a   : > { %441 = vmatprep.subr.bf16.mxu0 %v854_v26 }
  0x4c   : > { %773 = vmatpush3.bf16.msra.mxu1 %v849_v22 }
  0x4d   : > { %774 = vmatprep.subr.bf16.mxu1 %v927_v0  ;;  %442 = vmatpush1.bf16.msra.mxu0 %v856_v27 }
  0x50   : > { %775 = vmatpush3.bf16.msra.mxu1 %v853_v25 }
  0x51   : > { %776 = vmatprep.subr.bf16.mxu1 %v927_v0 }
  0x54   : > { %777 = vmatpush3.bf16.msra.mxu1 %v857_v28 }
  0xc3   : > { %v312_v29 = vpop.xlane.xlu0 %311 }
  0xc4   : > { %v314_v30 = vmul.f32 0.0078125, %v312_v29 }
  0xc6   : > { %v315_v31 = vadd.f32 1e-05, %v314_v30 }
  0xc8   : > { %858 = vrsqrt.f32 %v315_v31 }
  0xd5   : > { %v859_v39 = vpop.eup %858 }
  0xd6   : > { %v317_v40 = vmul.f32 %v859_v39, %v1060_v2 }
  0xd8   : > { %v324_v41 = vmul.f32 %v323_v37, %v317_v40 }
  0xda   : > { %v329_v42 = vsel %vm328_vm1, %v324_v41, %v1060_v2 }
  0xdb   : > { %v330_v43 = vpack.c.bf16 %v329_v42, %v329_v42 }
  0xdd   : > { %460 = vmatmul.mubr.bf16.vlgmr.msra.gmra.mxu0 %v330_v43  ;;  %779 = vmatmul.mubr.bf16.vlgmr.msra.gmra.mxu1 %v330_v43 }
 0x19d   : > { %v461_v44 = vpop.f32.mrf.mxu0  ;;  %v575_v45 = vpop.f32.mrf.mxu1 }
 0x19e   : > { %v581_v46 = vpack.c.bf16 %v575_v45, %v575_v45 }
 0x19f   : > { %v463_v47 = vpop.f32.mrf.mxu0  ;;  %v780_v48 = vpop.f32.mrf.mxu1 }
 0x1a0   : > { %582 = vst [vmem:[%s301_s22] sm:$0xf] %v581_v46  ;;  %v752_v49 = vpack.c.bf16 %v463_v47, %v461_v44 }
 0x1a1   : > { %v465_v50 = vpop.f32.mrf.mxu0  ;;  %v578_v51 = vpop.f32.mrf.mxu1 }
 0x1a2   : > { %476 = vst [vmem:[%s306_s13] sm:$0xff] %v752_v49 }
 0x1a3   : > { %v466_v52 = vpop.f32.mrf.mxu0  ;;  %v781_v53 = vpop.f32.mrf.mxu1 }
 0x1a4 PF: > { %p16_p1 = scmp.ge.s32.totalorder %s982_s23, 6   ;;  %s1141_s18 = smov %s914_s19 }
 0x1a5   : > { %s1142_s19 = smov %s918_s20  ;;  %s1143_s20 = smov %s992_s26 }
 0x1a6   : > { %s1144_s21 = smov %s982_s23  ;;  %18 = sbr.rel (!%p16_p1) target bundleno = 3 (0x3), region = 94 }
 0x1ab   :  { %618 = vsyncpa [#allocation3], 1 }
 0x1ac   :  { %620 = vsyncpa [#allocation3 + $0x1], 1 }

// kernel: encoder_forward.5
= control target key start
LH: loop header
LB: loop body
LE: loop exit
PB: predicated region body
PF: predicated region fallthrough
CT: control target
= control target key end

     0   :  { %s1262_s27 = smov 0   ;;  %s1264_s28 = smov 0   ;;  %s1444_s0 = inlined_call_operand.vmem [shape: bf16[4,8,128], index: 0, kind: input, shape index: {}]   ;;  %s1445_s1 = inlined_call_operand.vmem [shape: bf16[4,8,256], index: 1, kind: input, shape index: {}, may-alias: {1,2,3}]   ;;  %s1446_s2 = inlined_call_operand.vmem [shape: bf16[4,8,256], index: 2, kind: input, shape index: {}, may-alias: {1,2,3}]   ;;  %s1447_s3 = inlined_call_operand.vmem [shape: bf16[4,8,256], index: 3, kind: input, shape index: {}, may-alias: {1,2,3}]   ;;  %s1448_s4 = inlined_call_operand.vmem [shape: f32[3,8,64], index: 4, kind: input, shape index: {}]   ;;  %s1449_s5 = inlined_call_operand.vmem [shape: f32[3,8,64], index: 5, kind: input, shape index: {}]   ;;  %s1450_s6 = inlined_call_operand.vmem [shape: f32[24,64], index: 6, kind: input, shape index: {}]   ;;  %s1451_s7 = inlined_call_operand.vmem [shape: f32[24,64], index: 7, kind: input, shape index: {}]   ;;  %s1452_s8 = inlined_call_operand.vmem [shape: bf16[3,8,128], index: 8, kind: output, shape index: {}]  }
   0x1   :  { %s1266_s29 = smov 0  }
   0x2 LB: > { %s30_s30 = sadd.s32 1, %s1206_s28  ;;  %p1074_p0 = scmp.ge.s32.totalorder %s1210_s29, 1  ;;  %s1210_s29 = sphi %s1266_s29, %s18_s29   ;;  %s1206_s28 = sphi %s1264_s28, %s1456_s28   ;;  %s1202_s27 = sphi %s1262_s27, %s1455_s27  }
   0x3   : > { %p32_p1 = scmp.ge.s32.totalorder %s30_s30, 3  ;;  %p359_p2 = scmp.lt.s32.totalorder %s1210_s29, 4 }
   0x5   : > { %s1458_s30 = smov (%p32_p1, %s30_s30), 0  ;;  %p360_p3 = pnand %p1074_p0, %p359_p2 }
   0x6   : > { %p431_p4 = scmp.lt.s32.totalorder (!%p360_p3), %s1202_s27, 3  ;;  %s1212_s22 = smov (!%p360_p3), 96  }
   0x7   : > { %363 = sbr.rel (%p360_p3) target bundleno = 1511 (0x5e7), region = 52  ;;  %s1214_s23 = smov (!%p360_p3), 32  }
   0x8   : > { %p458_p5 = scmp.lt.s32.totalorder (!%p360_p3), %s1202_s27, 1  ;;  %s1216_s11 = smov (!%p360_p3), 64  }
   0x9   : > { %p520_p7 = scmp.ge.s32.totalorder (!%p360_p3), %s1202_s27, 1  ;;  %p478_p8 = scmp.lt.s32.totalorder (!%p360_p3), %s1202_s27, 2 }
   0xc   : > { %v1081_v0 = vld [vmem:[%s1445_s1 + $0x18] sm:$0xf]  ;;  %v1178_v1 = vld [vmem:[%s1446_s2] ss:$0 sps:$4 sm:$0xff]   ;;  %vm493_vm0 = vcmask 1043456   ;;  %s432_s13 = scalar_select %p431_p4, %s1202_s27, 3 }
   0xd   : > { %v496_v2 = vsel %vm493_vm0, %v1081_v0, %v1178_v1  ;;  %v1213_v12 = vmov 0.0   ;;  %vm1215_vm1 = vmmov 0   ;;  %s1326_s24 = scalar_select %p458_p5, %s1202_s27, 1  ;;  %v530_v17 = vld [vmem:[%s1450_s6 + $0x10] sm:$0xff]  ;;  %vm545_vm2 = vcmask 261120   ;;  %v529_v24 = vld [vmem:[%s1450_s6 + $0x8] sm:$0xff] }
   0xe   : > { %s1092_s14 = sshll.u32 %s432_s13, 3  ;;  %v1291_v3 = vunpack.c.l.bf16 %v496_v2  ;;  %s1075_s15 = sshll.u32 %s432_s13, 2  ;;  %v1302_v5 = vunpack.c.h.bf16 %v496_v2  ;;  %1107 = vmatprep.subr.bf16.mxu0 %v1213_v12  ;;  %1115 = vmatprep.subr.bf16.mxu1 %v1213_v12  ;;  %v533_v18 = vld [vmem:[%s1451_s7 + $0x10] sm:$0xff]  ;;  %v528_v25 = vld [vmem:[%s1450_s6] sm:$0xff]  ;;  %v532_v31 = vld [vmem:[%s1451_s7 + $0x8] sm:$0xff]  ;;  %vm594_vm3 = vcmask 523264  }
   0xf   : > { %s1296_s18 = scalar_lea.vmem %s1447_s3, %s1092_s14  ;;  %s437_s21 = scalar_lea.vmem %s1444_s0, %s1075_s15  ;;  %1111 = vmatprep.mubr.msk.bf16.mxu0 %vm1215_vm1, %v1213_v12  ;;  %1119 = vmatprep.mubr.msk.bf16.mxu1 %vm1215_vm1, %v1213_v12  ;;  %v1346_v28 = vld [vmem:[%s1451_s7] sm:$0xff]  ;;  %vm646_vm9 = vcmask 195584  }
  0x10   : > { %v489_v4 = vld [vmem:[%s1296_s18] sm:$0xf]  ;;  %v556_v6 = vsub.f32 0.0, %v1291_v3  ;;  %v557_v9 = vsub.f32 0.0, %v1302_v5  ;;  %v1168_v14 = vpack.i.bf16 %v1302_v5, %v1291_v3  ;;  %s460_s25 = sadd.s32 1, %s1326_s24  ;;  %v554_v32 = vmul.f32 %v1302_v5, %v529_v24  ;;  %s1093_s12 = sshll.u32 %s1326_s24, 3 }
  0x11   : > { %v486_v7 = vld [vmem:[%s437_s21] sm:$0xf]  ;;  %v1305_v8 = vunpack.c.l.bf16 %v489_v4  ;;  %p461_p6 = scmp.lt.s32.totalorder %s460_s25, 2  ;;  %v553_v35 = vmul.f32 %v1291_v3, %v528_v25  ;;  %s1094_s13 = sadd.s32 8, %s1093_s12 }
  0x12   : > { %562 = vrot.lane.b32.xlu1 %v556_v6, %s1212_s22  ;;  %v1308_v10 = vunpack.c.l.bf16 %v486_v7  ;;  %v512_v7 = vlaneseq  ;;  %s1462_s27 = smov (!%p478_p8, %s1202_s27), 2 }
  0x13   : > { %v558_v11 = vsub.f32 0.0, %v1305_v8  ;;  %s1460_s25 = smov (!%p461_p6, %s460_s25), 2  ;;  %v555_v20 = vmul.f32 %v1305_v8, %v530_v17 }
  0x14   : > { %v536_v13 = vsub.f32 0.0, %v1308_v10  ;;  %s1078_s14 = sshll.u32 %s1460_s25, 3 }
  0x15   : > { %566 = vrot.lane.b32.xlu0 %v558_v11, %s1212_s22  ;;  %s464_s25 = scalar_lea.vmem %s1448_s4, %s1078_s14  ;;  %s474_s10 = scalar_lea.vmem %s1449_s5, %s1078_s14 }
  0x16   : > { %564 = vrot.lane.b32.xlu1 %v557_v9, %s1212_s22  ;;  %v526_v42 = vld [vmem:[%s464_s25] sm:$0xff]  ;;  %s521_s14 = scalar_select %p520_p7, 1, 0 }
  0x17   : > { %v527_v43 = vld [vmem:[%s474_s10] sm:$0xff]  ;;  %v535_v47 = vmul.f32 %v1308_v10, %v526_v42 }
  0x19   : > { %578 = vrot.lane.b32.xlu0 %v1305_v8, %s1214_s23 }
  0x1a   : > { %538 = vrot.lane.b32.xlu1 %v536_v13, %s1212_s22 }
  0x1d   : > { %1169 = vrot.lane.b32.xlu0 %v1168_v14, %s1214_s23 }
  0x1e   : > { %743 = vrot.lane.b32.xlu1 %v558_v11, %s1214_s23  ;;  %v514_v11 = vstv %s1094_s13 }
  0x21   : > { %542 = vrot.lane.b32.xlu0 %v1308_v10, %s1214_s23 }
  0x25   : > { %752 = vrot.lane.b32.xlu0 %v1305_v8, %s1212_s22 }
  0x29   : > { %739 = vrot.lane.b32.xlu0 %v556_v6, %s1214_s23 }
  0x2d   : > { %741 = vrot.lane.b32.xlu0 %v557_v9, %s1214_s23  ;;  %v513_v9 = vshrl.u32 %v512_v7, 7 }
  0x31   : > { %1174 = vrot.lane.b32.xlu0 %v1168_v14, %s1212_s22  ;;  %v522_v14 = vstv %s521_s14 }
  0x32   : > { %vm523_vm5 = vcmp.eq.s32.totalorder %v522_v14, 1 }
  0x35   : > { %710 = vrot.lane.b32.xlu0 %v536_v13, %s1214_s23  ;;  %v517_v13 = vand.u32 127, %v512_v7 }
  0x37   : > { %vm519_vm4 = vcmp.lt.s32.totalorder %v517_v13, 16 }
  0x38   : > { %vm524_vm7 = vmor %vm519_vm4, %vm523_vm5 }
  0x39   : > { %713 = vrot.lane.b32.xlu0 %v1308_v10, %s1212_s22 }
  0x3d   : > { %731 = vrot.lane.b32.xlu0 %v530_v17, %s1216_s11 }
  0x84   : > { %v563_v16 = vpop.permute.xlu1 %562 }
  0x87   : > { %v567_v15 = vpop.permute.xlu0 %566 }
  0x88   : > { %v565_v23 = vpop.permute.xlu1 %564 }
  0x8b   : > { %v579_v19 = vpop.permute.xlu0 %578 }
  0x8c   : > { %v585_v21 = vsel %vm545_vm2, %v567_v15, %v579_v19  ;;  %v539_v34 = vpop.permute.xlu1 %538  ;;  %v515_v15 = vadd.s32 %v514_v11, %v513_v9 }
  0x8d   : > { %v588_v22 = vmul.f32 %v585_v21, %v533_v18 }
  0x8e   : > { %vm518_vm6 = vcmp.le.s32.totalorder %v517_v13, %v515_v15 }
  0x8f   : > { %v1170_v26 = vpop.permute.xlu0 %1169  ;;  %v591_v27 = vadd.f32 %v588_v22, %v555_v20  ;;  %vm1384_vm8 = vmand %vm518_vm6, %vm524_vm7 }
  0x90   : > { %v1172_v29 = vunpack.i.h.bf16 %v1170_v26  ;;  %v1171_v30 = vunpack.i.l.bf16 %v1170_v26  ;;  %v744_v54 = vpop.permute.xlu1 %743 }
  0x91   : > { %v593_v33 = vpack.c.bf16 %v591_v27, %v591_v27 }
  0x92   : > { %v583_v36 = vsel %vm545_vm2, %v563_v16, %v1171_v30  ;;  %v584_v37 = vsel %vm545_vm2, %v565_v23, %v1172_v29 }
  0x93   : > { %v586_v38 = vmul.f32 %v583_v36, %v1346_v28  ;;  %v587_v39 = vmul.f32 %v584_v37, %v532_v31  ;;  %v602_v40 = vsel %vm594_vm3, %v593_v33, 0  ;;  %v543_v41 = vpop.permute.xlu0 %542 }
  0x94   : > { %1108 = vmatpush3.bf16.xpose.msra.mxu0 %v602_v40  ;;  %v546_v44 = vsel %vm545_vm2, %v539_v34, %v543_v41 }
  0x95   : > { %v590_v45 = vadd.f32 %v587_v39, %v554_v32  ;;  %1109 = vmatprep.subr.bf16.mxu0 %v1213_v12  ;;  %v589_v46 = vadd.f32 %v586_v38, %v553_v35  ;;  %v547_v48 = vmul.f32 %v546_v44, %v527_v43 }
  0x97   : > { %v592_v49 = vpack.c.bf16 %v590_v45, %v589_v46  ;;  %v548_v50 = vadd.f32 %v547_v48, %v535_v47  ;;  %v753_v53 = vpop.permute.xlu0 %752  ;;  %v1179_v47 = vld [vmem:[%s1446_s2 + $0x4] ss:$0 sps:$4 sm:$0xff]  }
  0x98   : > { %v759_v55 = vsel %vm545_vm2, %v744_v54, %v753_v53 }
  0x99   : > { %v599_v51 = vsel %vm594_vm3, %v592_v49, 0  ;;  %v549_v52 = vpack.c.bf16 %v548_v50, %v548_v50  ;;  %v762_v56 = vmul.f32 %v759_v55, %v533_v18 }
  0x9b   : > { %v740_v57 = vpop.permute.xlu0 %739  ;;  %770 = vrot.lane.b32.xlu0 %v762_v56, %s1216_s11 }
  0x9c   : > { %1110 = vmatpush3.bf16.xpose.msra.mxu0 %v599_v51 }
  0x9d   : > { %1131 = vmatprep.subr.bf16.mxu0 %v1213_v12 }
  0x9f   : > { %v742_v58 = vpop.permute.xlu0 %741  ;;  %727 = vrot.lane.b32.xlu0 %v528_v25, %s1216_s11 }
  0xa3   : > { %1112 = vmatmul.mubr.msk.bf16.vlgmr.msra.gmra.mxu0 %vm594_vm3, %v549_v52  ;;  %v1175_v59 = vpop.permute.xlu0 %1174  ;;  %729 = vrot.lane.b32.xlu0 %v529_v24, %s1216_s11 }
  0xa4   : > { %1135 = vmatprep.mubr.msk.bf16.mxu0 %vm1215_vm1, %v1213_v12  ;;  %v1177_v60 = vunpack.i.h.bf16 %v1175_v59  ;;  %v1176_v61 = vunpack.i.l.bf16 %v1175_v59 }
  0xa6   : > { %v758_v62 = vsel %vm545_vm2, %v742_v58, %v1177_v60  ;;  %v757_v63 = vsel %vm545_vm2, %v740_v57, %v1176_v61 }
  0xa7   : > { %v761_v0 = vmul.f32 %v758_v62, %v532_v31  ;;  %v711_v1 = vpop.permute.xlu0 %710  ;;  %v760_v24 = vmul.f32 %v757_v63, %v1346_v28 }
  0xa9   : > { %768 = vrot.lane.b32.xlu0 %v761_v0, %s1216_s11 }
  0xab   : > { %v714_v2 = vpop.permute.xlu0 %713 }
  0xac   : > { %v716_v4 = vsel %vm545_vm2, %v711_v1, %v714_v2 }
  0xad   : > { %v717_v6 = vmul.f32 %v716_v4, %v527_v43  ;;  %706 = vrot.lane.b32.xlu0 %v526_v42, %s1216_s11 }
  0xaf   : > { %v732_v25 = vpop.permute.xlu0 %731 }
  0xb0   : > { %v738_v26 = vmul.f32 %v732_v25, %v1305_v8 }
  0xb1   : > { %719 = vrot.lane.b32.xlu0 %v717_v6, %s1216_s11 }
 0x10d   : > { %v771_v27 = vpop.permute.xlu0 %770 }
 0x10e   : > { %v777_v29 = vadd.f32 %v771_v27, %v738_v26 }
 0x110   : > { %v779_v30 = vpack.c.bf16 %v777_v29, %v777_v29 }
 0x111   : > { %v728_v31 = vpop.permute.xlu0 %727 }
 0x112   : > { %v736_v28 = vmul.f32 %v728_v31, %v1291_v3  ;;  %v500_v3 = vld [vmem:[%s1296_s18 + $0x4] sm:$0xf]  ;;  %s1080_s18 = sshll.u32 %s1462_s27, 2 }
 0x113   : > { %v663_v48 = vsel %vm493_vm0, %v500_v3, 0  ;;  %s484_s21 = scalar_lea.vmem %s1452_s8, %s1080_s18 }
 0x114   : > { %1116 = vmatpush3.bf16.msra.mxu1 %v663_v48 }
 0x115   : > { %v730_v32 = vpop.permute.xlu0 %729  ;;  %1117 = vmatprep.subr.bf16.mxu1 %v1213_v12 }
 0x116   : > { %v737_v35 = vmul.f32 %v730_v32, %v1302_v5 }
 0x11b   : > { %v769_v33 = vpop.permute.xlu0 %768 }
 0x11c   : > { %v776_v40 = vadd.f32 %v769_v33, %v737_v35 }
 0x11f   : > { %v707_v34 = vpop.permute.xlu0 %706 }
 0x120   : > { %v709_v38 = vmul.f32 %v707_v34, %v1308_v10  ;;  %v1083_v10 = vld [vmem:[%s1445_s1 + $0x1c] sm:$0xf] }
 0x121   : > { %v506_v49 = vsel %vm493_vm0, %v1083_v10, %v1179_v47 }
 0x122   : > { %1118 = vmatpush3.bf16.msra.mxu1 %v506_v49 }
 0x123   : > { %v720_v39 = vpop.permute.xlu0 %719  ;;  %1123 = vmatprep.subr.bf16.mxu1 %v1213_v12 }
 0x124   : > { %v722_v43 = vadd.f32 %v720_v39, %v709_v38 }
 0x126   : > { %v723_v45 = vpack.c.bf16 %v722_v43, %v722_v43 }
 0x163   : > { %v638_v16 = vpop.f32.mrf.mxu0 }
 0x164   : > { %v644_v18 = vmul.f32 0.125, %v638_v16 }
 0x165   : > { %v1113_v19 = vpop.f32.mrf.mxu0 }
 0x166   : > { %v645_v20 = vsel %vm1384_vm8, %v644_v18, -1e+30 }
 0x167   : > { %v641_v21 = vpop.f32.mrf.mxu0  ;;  %v647_v22 = vsel %vm646_vm9, %v645_v20, -inf }
 0x168   : > { %648 = vmax.xlane.f32.xlu1 %v647_v22 }
 0x169   : > { %v1114_v23 = vpop.f32.mrf.mxu0 }
 0x179   : > { %766 = vrot.lane.b32.xlu1 %v760_v24, %s1216_s11 }
 0x17d   : > { %787 = vrot.lane.b32.xlu1 %v779_v30, %s1216_s11 }
 0x1f1   : > { %v649_v36 = vpop.xlane.xlu1 %648 }
 0x1f2   : > { %v650_v37 = vsub.f32 %v645_v20, %v649_v36 }
 0x1f4   : > { %v651_v8 = vmul.f32 1.442695, %v650_v37 }
 0x1f5   : > { %v767_v41 = vpop.permute.xlu1 %766 }
 0x1f6   : > { %1180 = vpow2.f32 %v651_v8  ;;  %v775_v42 = vadd.f32 %v767_v41, %v736_v28 }
 0x1f8   : > { %v778_v44 = vpack.c.bf16 %v776_v40, %v775_v42 }
 0x1f9   : > { %v788_v53 = vpop.permute.xlu1 %787 }
 0x1fa   : > { %785 = vrot.lane.b32.xlu1 %v778_v44, %s1216_s11  ;;  %v796_v55 = vsel %vm594_vm3, %v788_v53, 0 }
 0x1fe   : > { %781 = vrot.lane.b32.xlu1 %v723_v45, %s1216_s11 }
 0x203   : > { %v1181_v5 = vpop.eup %1180 }
 0x204   : > { %v653_v46 = vsel %vm646_vm9, %v1181_v5, 0.0 }
 0x205   : > { %654 = vadd.xlane.f32.xlu0 %v653_v46 }
 0x26c   : > { %v786_v56 = vpop.permute.xlu1 %785 }
 0x26d   : > { %v793_v57 = vsel %vm594_vm3, %v786_v56, 0 }
 0x270   : > { %v782_v58 = vpop.permute.xlu1 %781 }
 0x28e   : > { %v655_v50 = vpop.xlane.xlu0 %654 }
 0x28f   : > { %1182 = vrcp.f32 %v655_v50 }
 0x29c   : > { %v1183_v51 = vpop.eup %1182 }
 0x29d   : > { %v657_v52 = vmul.f32 %v1183_v51, %v1181_v5 }
 0x29f   : > { %v658_v54 = vpack.c.bf16 %v657_v52, %v657_v52 }
 0x2a1   : > { %1120 = vmatmul.mubr.msk.bf16.vlgmr.msra.gmra.mxu1 %vm646_vm9, %v658_v54 }
 0x2a2   : > { %1124 = vmatpush3.bf16.xpose.msra.mxu1 %v796_v55  ;;  %1127 = vmatprep.mubr.msk.bf16.mxu1 %vm1215_vm1, %v1213_v12 }
 0x2a3   : > { %1125 = vmatprep.subr.bf16.mxu1 %v1213_v12 }
 0x2aa   : > { %1126 = vmatpush3.bf16.xpose.msra.mxu1 %v793_v57 }
 0x2b1   : > { %1128 = vmatmul.mubr.msk.bf16.vlgmr.msra.gmra.mxu1 %vm594_vm3, %v782_v58 }
 0x361   : > { %v699_v59 = vpop.f32.mrf.mxu1 }
 0x363   : > { %v1121_v60 = vpop.f32.mrf.mxu1 }
 0x365   : > { %v702_v61 = vpop.f32.mrf.mxu1 }
 0x367   : > { %v1122_v62 = vpop.f32.mrf.mxu1 }
 0x371   : > { %v832_v63 = vpop.f32.mrf.mxu1 }
 0x372   : > { %v838_v0 = vmul.f32 0.125, %v832_v63 }
 0x373   : > { %v1129_v1 = vpop.f32.mrf.mxu1 }
 0x374   : > { %v839_v2 = vsel %vm1384_vm8, %v838_v0, -1e+30 }
 0x375   : > { %v835_v4 = vpop.f32.mrf.mxu1  ;;  %v840_v6 = vsel %vm646_vm9, %v839_v2, -inf }
 0x376   : > { %841 = vmax.xlane.f32.xlu1 %v840_v6 }
 0x377   : > { %v1130_v7 = vpop.f32.mrf.mxu1 }
 0x387   : > { %854 = vrot.lane.b32.xlu1 %v506_v49, %s1216_s11 }
 0x3ff   : > { %v842_v9 = vpop.xlane.xlu1 %841 }
 0x400   : > { %v843_v11 = vsub.f32 %v839_v2, %v842_v9 }
 0x402   : > { %v844_v13 = vmul.f32 1.442695, %v843_v11 }
 0x403   : > { %v855_v19 = vpop.permute.xlu1 %854 }
 0x404   : > { %1184 = vpow2.f32 %v844_v13 }
 0x411   : > { %v1185_v14 = vpop.eup %1184 }
 0x412   : > { %v846_v15 = vsel %vm646_vm9, %v1185_v14, 0.0 }
 0x413   : > { %847 = vadd.xlane.f32.xlu0 %v846_v15 }
 0x429   : > { %856 = vrot.lane.b32.xlu0 %v500_v3, %s1216_s11 }
 0x49c   : > { %v848_v16 = vpop.xlane.xlu0 %847 }
 0x49d   : > { %1186 = vrcp.f32 %v848_v16 }
 0x4a0   : > { %v857_v17 = vpop.permute.xlu0 %856 }
 0x4a1   : > { %v863_v18 = vsel %vm493_vm0, %v857_v17, 0 }
 0x4a2   : > { %1132 = vmatpush3.bf16.msra.mxu0 %v863_v18 }
 0x4a3   : > { %1133 = vmatprep.subr.bf16.mxu0 %v1213_v12 }
 0x4a6   : > { %1134 = vmatpush3.bf16.msra.mxu0 %v855_v19 }
 0x4aa   : > { %v1187_v20 = vpop.eup %1186 }
 0x4ab   : > { %v850_v21 = vmul.f32 %v1187_v20, %v1185_v14 }
 0x4ad   : > { %v851_v22 = vpack.c.bf16 %v850_v21, %v850_v21 }
 0x4af   : > { %1136 = vmatmul.mubr.msk.bf16.vlgmr.msra.gmra.mxu0 %vm646_vm9, %v851_v22 }
 0x56f   : > { %v899_v23 = vpop.f32.mrf.mxu0 }
 0x570   : > { %906 = vrot.lane.b32.xlu0 %v899_v23, %s1216_s11 }
 0x571   : > { %v1137_v24 = vpop.f32.mrf.mxu0 }
 0x573   : > { %v902_v25 = vpop.f32.mrf.mxu0 }
 0x575   : > { %v1138_v26 = vpop.f32.mrf.mxu0 }
 0x5e2   : > { %v907_v27 = vpop.permute.xlu0 %906 }
 0x5e3   : > { %v909_v12 = vsel %vm594_vm3, %v699_v59, %v907_v27 }
 0x5e4   : > { %v910_v29 = vpack.c.bf16 %v909_v12, %v909_v12 }
 0x5e6   : > { %911 = vst [vmem:[%s484_s21] sm:$0xf] %v910_v29 }
 0x5e7 PF: > { %s18_s29 = sadd.s32 1, %s1210_s29   ;;  %s1455_s27 = smov %s1206_s28 }
 0x5e8   : > { %p15_p9 = scmp.ge.s32.totalorder %s18_s29, 5   ;;  %s1456_s28 = smov %s1458_s30 }
 0x5ea   :  { %17 = sbr.rel (!%p15_p9) target bundleno = 2 (0x2), region = 97 }

// kernel: encoder_forward.6
= control target key start
LH: loop header
LB: loop body
LE: loop exit
PB: predicated region body
PF: predicated region fallthrough
CT: control target
= control target key end

     0   :  { %s1207_s24 = smov 0   ;;  %s1409_s0 = inlined_call_operand.vmem [shape: bf16[3,8,128], index: 0, kind: input, shape index: {}]   ;;  %s1410_s1 = inlined_call_operand.vmem [shape: bf16[3,8,128], index: 1, kind: input, shape index: {}]   ;;  %s1411_s2 = inlined_call_operand.vmem [shape: bf16[128,128], index: 2, kind: input, shape index: {}]   ;;  %s1412_s3 = inlined_call_operand.vmem [shape: bf16[1,128], index: 3, kind: input, shape index: {}]   ;;  %s1413_s4 = inlined_call_operand.vmem [shape: bf16[128,256], index: 4, kind: input, shape index: {}]   ;;  %s1414_s5 = inlined_call_operand.vmem [shape: bf16[128,256], index: 5, kind: input, shape index: {}]   ;;  %s1415_s6 = inlined_call_operand.vmem [shape: bf16[256,128], index: 6, kind: input, shape index: {}]   ;;  %s1416_s7 = inlined_call_operand.vmem [shape: bf16[3,8,128], index: 7, kind: output, shape index: {}]  }
   0x1 LB: > { %s944_s25 = sadd.s32 4294967295, %s1162_s24   ;;  %p948_p0 = scmp.ge.s32.totalorder %s1162_s24, 1  ;;  %s1162_s24 = sphi %s1207_s24, %s17_s24  }
   0x2   : > { %p245_p1 = scmp.lt.s32.totalorder %s1162_s24, 4 }
   0x4   : > { %p246_p2 = pnand %p948_p0, %p245_p1 }
   0x5   : > { %p279_p3 = scmp.lt.s32.totalorder (!%p246_p2), %s944_s25, 2 }
   0x6   : > { %249 = sbr.rel (%p246_p2) target bundleno = 839 (0x347), region = 48 }
   0xb   : > { %v1074_v0 = vld [vmem:[%s1411_s2 + $0x38] sm:$0xff]   ;;  %v1164_v1 = vmov 0.0   ;;  %v1075_v2 = vld [vmem:[%s1411_s2 + $0x30] sm:$0xff]   ;;  %vm1165_vm0 = vmmov 0   ;;  %v1076_v3 = vld [vmem:[%s1411_s2 + $0x28] sm:$0xff]   ;;  %s1418_s25 = smov (!%p279_p3, %s944_s25), 2  ;;  %v410_v54 = vlaneseq }
   0xc   : > { %1043 = vmatprep.subr.bf16.mxu0 %v1164_v1  ;;  %1059 = vmatprep.mubr.msk.bf16.mxu0 %vm1165_vm0, %v1164_v1  ;;  %v1077_v4 = vld [vmem:[%s1411_s2 + $0x20] sm:$0xff]   ;;  %v1078_v5 = vld [vmem:[%s1411_s2 + $0x18] sm:$0xff]   ;;  %v1079_v6 = vld [vmem:[%s1411_s2 + $0x10] sm:$0xff]   ;;  %s1233_s15 = sshll.u32 %s1418_s25, 2  ;;  %v1166_v44 = vmov 0  }
   0xd   : > { %1044 = vmatpush3.bf16.msra.mxu0 %v1074_v0  ;;  %v1080_v7 = vld [vmem:[%s1411_s2 + $0x8] sm:$0xff]   ;;  %v1081_v8 = vld [vmem:[%s1411_s2] sm:$0xff]   ;;  %s282_s22 = scalar_lea.vmem %s1409_s0, %s1233_s15  ;;  %v1082_v10 = vld [vmem:[%s1413_s4 + $0x74] ss:$8 sps:$4 sm:$0xff]   ;;  %s286_s20 = scalar_lea.vmem %s1410_s1, %s1233_s15  ;;  %544 = vmatprep.mubr.bf16.mxu1 %v1166_v44  ;;  %v411_v55 = vshrl.u32 %v410_v54, 7 }
   0xe   : > { %1045 = vmatprep.subr.bf16.mxu0 %v1164_v1  ;;  %v292_v9 = vld [vmem:[%s282_s22] sm:$0xf]  ;;  %v1084_v11 = vld [vmem:[%s1414_s5 + $0x70] ss:$8 sps:$4 sm:$0xff]   ;;  %v1086_v12 = vld [vmem:[%s1414_s5 + $0x74] ss:$8 sps:$4 sm:$0xff]   ;;  %512 = vmatprep.subr.bf16.mxu1 %v1082_v10  ;;  %s290_s21 = scalar_lea.vmem %s1416_s7, %s1233_s15 }
   0xf   : > { %v1087_v13 = vld [vmem:[%s1413_s4 + $0x70] ss:$8 sps:$4 sm:$0xff]   ;;  %v1088_v14 = vld [vmem:[%s1413_s4 + $0x64] ss:$8 sps:$4 sm:$0xff]   ;;  %v1090_v16 = vld [vmem:[%s1414_s5 + $0x60] ss:$8 sps:$4 sm:$0xff]  }
  0x10   : > { %v1092_v15 = vld [vmem:[%s1414_s5 + $0x64] ss:$8 sps:$4 sm:$0xff]   ;;  %513 = vmatpush1.bf16.msra.mxu1 %v1087_v13  ;;  %v1093_v17 = vld [vmem:[%s1413_s4 + $0x60] ss:$8 sps:$4 sm:$0xff]   ;;  %v1094_v26 = vld [vmem:[%s1413_s4 + $0x54] ss:$8 sps:$4 sm:$0xff]  }
  0x11   : > { %1046 = vmatpush3.bf16.msra.mxu0 %v1075_v2  ;;  %514 = vmatprep.subr.bf16.mxu1 %v1088_v14  ;;  %v293_v18 = vld [vmem:[%s286_s20] sm:$0xf]  ;;  %v1098_v27 = vld [vmem:[%s1414_s5 + $0x54] ss:$8 sps:$4 sm:$0xff]   ;;  %v1096_v28 = vld [vmem:[%s1414_s5 + $0x50] ss:$8 sps:$4 sm:$0xff]  }
  0x12   : > { %1047 = vmatprep.subr.bf16.mxu0 %v1164_v1  ;;  %v294_v19 = vunpack.c.l.bf16 %v293_v18  ;;  %v1099_v29 = vld [vmem:[%s1413_s4 + $0x50] ss:$8 sps:$4 sm:$0xff]   ;;  %v1100_v30 = vld [vmem:[%s1413_s4 + $0x44] ss:$8 sps:$4 sm:$0xff]   ;;  %v1102_v32 = vld [vmem:[%s1414_s5 + $0x40] ss:$8 sps:$4 sm:$0xff]  }
  0x13   : > { %v1104_v31 = vld [vmem:[%s1414_s5 + $0x44] ss:$8 sps:$4 sm:$0xff]   ;;  %v1105_v33 = vld [vmem:[%s1413_s4 + $0x40] ss:$8 sps:$4 sm:$0xff]   ;;  %v1106_v34 = vld [vmem:[%s1413_s4 + $0x34] ss:$8 sps:$4 sm:$0xff]  }
  0x14   : > { %515 = vmatpush1.bf16.msra.mxu1 %v1093_v17  ;;  %v1110_v35 = vld [vmem:[%s1414_s5 + $0x34] ss:$8 sps:$4 sm:$0xff]   ;;  %v1108_v36 = vld [vmem:[%s1414_s5 + $0x30] ss:$8 sps:$4 sm:$0xff]   ;;  %v1112_v38 = vld [vmem:[%s1413_s4 + $0x24] ss:$8 sps:$4 sm:$0xff]  }
  0x15   : > { %1048 = vmatpush3.bf16.msra.mxu0 %v1076_v3  ;;  %516 = vmatprep.subr.bf16.mxu1 %v1094_v26  ;;  %v1111_v37 = vld [vmem:[%s1413_s4 + $0x30] ss:$8 sps:$4 sm:$0xff]   ;;  %v1116_v39 = vld [vmem:[%s1414_s5 + $0x24] ss:$8 sps:$4 sm:$0xff]   ;;  %v1114_v40 = vld [vmem:[%s1414_s5 + $0x20] ss:$8 sps:$4 sm:$0xff]  }
  0x16   : > { %1049 = vmatprep.subr.bf16.mxu0 %v1164_v1  ;;  %v1117_v41 = vld [vmem:[%s1413_s4 + $0x20] ss:$8 sps:$4 sm:$0xff]   ;;  %v1118_v42 = vld [vmem:[%s1413_s4 + $0x14] ss:$8 sps:$4 sm:$0xff]   ;;  %v1120_v45 = vld [vmem:[%s1414_s5 + $0x10] ss:$8 sps:$4 sm:$0xff]  }
  0x17   : > { %v1122_v43 = vld [vmem:[%s1414_s5 + $0x14] ss:$8 sps:$4 sm:$0xff]   ;;  %v1123_v46 = vld [vmem:[%s1413_s4 + $0x10] ss:$8 sps:$4 sm:$0xff]   ;;  %v1124_v47 = vld [vmem:[%s1413_s4 + $0x4] ss:$8 sps:$4 sm:$0xff]  }
  0x18   : > { %517 = vmatpush1.bf16.msra.mxu1 %v1099_v29  ;;  %v1128_v48 = vld [vmem:[%s1414_s5 + $0x4] ss:$8 sps:$4 sm:$0xff]   ;;  %v1126_v49 = vld [vmem:[%s1414_s5] ss:$8 sps:$4 sm:$0xff]   ;;  %v412_v58 = vsub.s32 0, %v411_v55  ;;  %v1130_v0 = vld [vmem:[%s1415_s6 + $0x78] sm:$0xff]  }
  0x19   : > { %1050 = vmatpush3.bf16.msra.mxu0 %v1077_v4  ;;  %518 = vmatprep.subr.bf16.mxu1 %v1100_v30  ;;  %v1129_v50 = vld [vmem:[%s1413_s4] ss:$8 sps:$4 sm:$0xff]   ;;  %v1132_v2 = vld [vmem:[%s1415_s6 + $0x70] sm:$0xff]  }
  0x1a   : > { %1051 = vmatprep.subr.bf16.mxu0 %v1164_v1  ;;  %v408_v56 = vld [vmem:[%s1412_s3] sm:$0x1]  ;;  %v1133_v3 = vld [vmem:[%s1415_s6 + $0x30] sm:$0xff]   ;;  %v1134_v4 = vld [vmem:[%s1415_s6 + $0x68] sm:$0xff]  }
  0x1b   : > { %v409_v57 = vunpack.c.l.bf16 %v408_v56  ;;  %v1140_v10 = vld [vmem:[%s1415_s6 + $0x50] sm:$0xff]   ;;  %v1143_v13 = vld [vmem:[%s1415_s6 + $0x8] sm:$0xff]   ;;  %v1144_v14 = vld [vmem:[%s1415_s6 + $0x40] sm:$0xff]  }
  0x1c   : > { %519 = vmatpush1.bf16.msra.mxu1 %v1105_v33 }
  0x1d   : > { %1052 = vmatpush3.bf16.msra.mxu0 %v1078_v5  ;;  %520 = vmatprep.subr.bf16.mxu1 %v1106_v34  ;;  %v413_v59 = vrot.slane %v409_v57, %v412_v58  ;;  %v1135_v5 = vld [vmem:[%s1415_s6 + $0x28] sm:$0xff]  }
  0x1e   : > { %1053 = vmatprep.subr.bf16.mxu0 %v1164_v1 }
  0x20   : > { %521 = vmatpush1.bf16.msra.mxu1 %v1111_v37 }
  0x21   : > { %1054 = vmatpush3.bf16.msra.mxu0 %v1079_v6  ;;  %522 = vmatprep.subr.bf16.mxu1 %v1112_v38  ;;  %v1136_v6 = vld [vmem:[%s1415_s6 + $0x60] sm:$0xff]  }
  0x22   : > { %1055 = vmatprep.subr.bf16.mxu0 %v1164_v1 }
  0x24   : > { %523 = vmatpush1.bf16.msra.mxu1 %v1117_v41 }
  0x25   : > { %1056 = vmatpush3.bf16.msra.mxu0 %v1080_v7  ;;  %524 = vmatprep.subr.bf16.mxu1 %v1118_v42  ;;  %v1137_v7 = vld [vmem:[%s1415_s6 + $0x20] sm:$0xff]  }
  0x26   : > { %1057 = vmatprep.subr.bf16.mxu0 %v1164_v1  ;;  %v1131_v1 = vld [vmem:[%s1415_s6 + $0x38] sm:$0xff]  }
  0x28   : > { %525 = vmatpush1.bf16.msra.mxu1 %v1123_v46 }
  0x29   : > { %1058 = vmatpush3.bf16.msra.mxu0 %v1081_v8  ;;  %526 = vmatprep.subr.bf16.mxu1 %v1124_v47  ;;  %v1138_v8 = vld [vmem:[%s1415_s6 + $0x58] sm:$0xff]  }
  0x2a   : > { %649 = vmatprep.subr.bf16.mxu0 %v1086_v12  ;;  %v1142_v12 = vld [vmem:[%s1415_s6 + $0x48] sm:$0xff]  }
  0x2c   : > { %1060 = vmatmul.mubr.bf16.vlgmr.msra.gmra.mxu0 %v292_v9  ;;  %527 = vmatpush1.bf16.msra.mxu1 %v1129_v50  ;;  %v1139_v9 = vld [vmem:[%s1415_s6 + $0x18] sm:$0xff]  }
  0x2d   : > { %650 = vmatpush1.bf16.msra.mxu0 %v1084_v11  ;;  %681 = vmatprep.mubr.bf16.mxu0 %v1166_v44  ;;  %v1141_v11 = vld [vmem:[%s1415_s6 + $0x10] sm:$0xff]  }
  0x2e   : > { %651 = vmatprep.subr.bf16.mxu0 %v1092_v15  ;;  %1021 = vmatprep.subr.bf16.mxu1 %v1130_v0  ;;  %v1145_v15 = vld [vmem:[%s1415_s6] sm:$0xff]  }
  0x31   : > { %652 = vmatpush1.bf16.msra.mxu0 %v1090_v16 }
  0x32   : > { %653 = vmatprep.subr.bf16.mxu0 %v1098_v27 }
  0x35   : > { %654 = vmatpush1.bf16.msra.mxu0 %v1096_v28 }
  0x36   : > { %655 = vmatprep.subr.bf16.mxu0 %v1104_v31 }
  0x39   : > { %656 = vmatpush1.bf16.msra.mxu0 %v1102_v32 }
  0x3a   : > { %657 = vmatprep.subr.bf16.mxu0 %v1110_v35 }
  0x3d   : > { %658 = vmatpush1.bf16.msra.mxu0 %v1108_v36 }
  0x3e   : > { %659 = vmatprep.subr.bf16.mxu0 %v1116_v39 }
  0x41   : > { %660 = vmatpush1.bf16.msra.mxu0 %v1114_v40 }
  0x42   : > { %661 = vmatprep.subr.bf16.mxu0 %v1122_v43 }
  0x45   : > { %662 = vmatpush1.bf16.msra.mxu0 %v1120_v45 }
  0x46   : > { %663 = vmatprep.subr.bf16.mxu0 %v1128_v48 }
  0x49   : > { %664 = vmatpush1.bf16.msra.mxu0 %v1126_v49 }
  0xec   : > { %v393_v20 = vpop.f32.mrf.mxu0 }
  0xed   : > { %v1273_v21 = vadd.f32 %v393_v20, %v294_v19 }
  0xee   : > { %v1061_v22 = vpop.f32.mrf.mxu0 }
  0xef   : > { %v400_v23 = vmul.f32 %v1273_v21, %v1273_v21 }
  0xf0   : > { %v396_v24 = vpop.f32.mrf.mxu0 }
  0xf1   : > { %401 = vadd.xlane.f32.xlu0 %v400_v23 }
  0xf2   : > { %v1062_v25 = vpop.f32.mrf.mxu0 }
 0x17a   : > { %v402_v51 = vpop.xlane.xlu0 %401 }
 0x17b   : > { %v404_v52 = vmul.f32 0.0078125, %v402_v51 }
 0x17d   : > { %v405_v53 = vadd.f32 1e-05, %v404_v52 }
 0x17f   : > { %1146 = vrsqrt.f32 %v405_v53 }
 0x18c   : > { %v1147_v60 = vpop.eup %1146 }
 0x18d   : > { %v407_v61 = vmul.f32 %v1147_v60, %v1273_v21 }
 0x18f   : > { %v414_v62 = vmul.f32 %v413_v59, %v407_v61 }
 0x191   : > { %v415_v63 = vpack.c.bf16 %v414_v62, %v414_v62 }
 0x193   : > { %545 = vmatmul.mubr.bf16.vlgmr.msra.gmra.mxu1 %v415_v63  ;;  %682 = vmatmul.mubr.bf16.vlgmr.msra.gmra.mxu0 %v415_v63 }
 0x194   : > { %1022 = vmatpush3.bf16.msra.mxu1 %v1131_v1 }
 0x195   : > { %1023 = vmatprep.subr.bf16.mxu1 %v1132_v2 }
 0x198   : > { %1024 = vmatpush3.bf16.msra.mxu1 %v1133_v3 }
 0x199   : > { %1025 = vmatprep.subr.bf16.mxu1 %v1134_v4 }
 0x19c   : > { %1026 = vmatpush3.bf16.msra.mxu1 %v1135_v5 }
 0x19d   : > { %1027 = vmatprep.subr.bf16.mxu1 %v1136_v6 }
 0x1a0   : > { %1028 = vmatpush3.bf16.msra.mxu1 %v1137_v7 }
 0x1a1   : > { %1029 = vmatprep.subr.bf16.mxu1 %v1138_v8 }
 0x1a4   : > { %1030 = vmatpush3.bf16.msra.mxu1 %v1139_v9 }
 0x1a5   : > { %1031 = vmatprep.subr.bf16.mxu1 %v1140_v10 }
 0x1a8   : > { %1032 = vmatpush3.bf16.msra.mxu1 %v1141_v11 }
 0x1a9   : > { %1033 = vmatprep.subr.bf16.mxu1 %v1142_v12 }
 0x1ac   : > { %1034 = vmatpush3.bf16.msra.mxu1 %v1143_v13 }
 0x1ad   : > { %1035 = vmatprep.subr.bf16.mxu1 %v1144_v14 }
 0x1b0   : > { %1036 = vmatpush3.bf16.msra.mxu1 %v1145_v15 }
 0x253   : > { %v546_v16 = vpop.f32.mrf.mxu1  ;;  %v683_v17 = vpop.f32.mrf.mxu0 }
 0x254   : > { %v992_v18 = vmul.f32 -1.442695, %v546_v16 }
 0x255   : > { %v548_v19 = vpop.f32.mrf.mxu1  ;;  %v685_v20 = vpop.f32.mrf.mxu0 }
 0x256   : > { %1148 = vpow2.f32 %v992_v18  ;;  %v993_v22 = vmul.f32 -1.442695, %v548_v19 }
 0x257   : > { %v550_v23 = vpop.f32.mrf.mxu1  ;;  %v687_v24 = vpop.f32.mrf.mxu0 }
 0x258   : > { %1150 = vpow2.f32 %v993_v22 }
 0x259   : > { %v551_v25 = vpop.f32.mrf.mxu1  ;;  %v688_v26 = vpop.f32.mrf.mxu0 }
 0x263   : > { %v1149_v27 = vpop.eup %1148 }
 0x264   : > { %v696_v28 = vadd.f32 1.0, %v1149_v27 }
 0x265   : > { %v1151_v29 = vpop.eup %1150 }
 0x266   : > { %1152 = vrcp.f32 %v696_v28  ;;  %v697_v30 = vadd.f32 1.0, %v1151_v29 }
 0x268   : > { %1154 = vrcp.f32 %v697_v30 }
 0x273   : > { %v1153_v31 = vpop.eup %1152 }
 0x274   : > { %v702_v32 = vmul.f32 %v1153_v31, %v546_v16 }
 0x275   : > { %v1155_v33 = vpop.eup %1154 }
 0x276   : > { %v703_v34 = vmul.f32 %v1155_v33, %v548_v19  ;;  %v704_v35 = vmul.f32 %v702_v32, %v683_v17 }
 0x278   : > { %v705_v36 = vmul.f32 %v703_v34, %v685_v20  ;;  %v706_v38 = vpack.c.bf16 %v704_v35, %v704_v35 }
 0x27a   : > { %v707_v37 = vpack.c.bf16 %v705_v36, %v705_v36 }
 0x27c   : > { %868 = vmatprep.mubr.bf16.mxu1 %v707_v37 }
 0x27d   : > { %869 = vmatmul.mubr.bf16.vlgmr.msra.gmra.mxu1 %v706_v38 }
 0x33d   : > { %v1037_v39 = vpop.f32.mrf.mxu1 }
 0x33f   : > { %v1038_v40 = vpop.f32.mrf.mxu1 }
 0x340   : > { %v1039_v41 = vadd.f32 %v1038_v40, %v1037_v39 }
 0x341   : > { %v1040_v42 = vpop.f32.mrf.mxu1 }
 0x342   : > { %v876_v43 = vadd.f32 %v1039_v41, %v1273_v21 }
 0x343   : > { %v1041_v44 = vpop.f32.mrf.mxu1 }
 0x344   : > { %v877_v45 = vpack.c.bf16 %v876_v43, %v876_v43 }
 0x346   : > { %878 = vst [vmem:[%s290_s21] sm:$0xf] %v877_v45 }
 0x347 PF: > { %s17_s24 = sadd.s32 1, %s1162_s24  }
 0x348   : > { %p14_p4 = scmp.ge.s32.totalorder %s17_s24, 5  }
 0x34a   :  { %16 = sbr.rel (!%p14_p4) target bundleno = 1 (0x1), region = 81 }

</bundles_post_ra>
